<compile_context>
chip_gen: v5e
topology: v5e:2x2
jax: 0.10.0
libtpu: 0.0.40
codegen_flags: <defaults>
</compile_context>

<pallas_src>
import jax
import jax.numpy as jnp
from jax.experimental import pallas as pl
from jax.experimental.pallas import tpu as pltpu

INPUT_SIZE = 64
HIDDEN_SIZE = 40
NUM_LAYERS = 5


def rnn_kernel(x_ref, w_ih0_ref, w_ihr_ref, w_hh_ref, b_ref, o_ref):
    """5-layer tanh RNN; writes the top layer's last-timestep hidden state.

    x_ref:     (T*Bp, IN)   time-major flattened input (layer-0 input)
    w_ih0_ref: (IN, H)      layer-0 input->hidden weight, pre-transposed
    w_ihr_ref: (L-1, H, H)  layers 1..L-1 input->hidden weights, pre-transposed
    w_hh_ref:  (L, H, H)    hidden->hidden weights, pre-transposed
    b_ref:     (L, 1, H)    combined bias (b_ih + b_hh)
    o_ref:     (Bp, H)      last-timestep hidden of top layer
    """
    TB = x_ref.shape[0]
    Bp, H = o_ref.shape
    T = TB // Bp
    L = w_hh_ref.shape[0]

    # ---- layer 0: input projection batched over all T*Bp rows (one MXU call) ----
    pre = (jnp.dot(x_ref[...], w_ih0_ref[...], preferred_element_type=jnp.float32)
           + b_ref[0])                                            # (T*Bp, H)

    h = jnp.zeros((Bp, H), jnp.float32)
    for l in range(L):                          # layers are sequential (L=5, unrolled)
        w_hh = w_hh_ref[l]                      # (H, H), loaded once per layer
        h = jnp.zeros((Bp, H), jnp.float32)     # h_0 = 0 (PyTorch default)
        outs = []
        for t in range(T):                      # serial chain: only h@w_hh + add + tanh
            h = jnp.tanh(pre[t * Bp:(t + 1) * Bp, :]
                         + jnp.dot(h, w_hh, preferred_element_type=jnp.float32))
            outs.append(h)
        if l < L - 1:
            # Layer handoff stays in vregs; the next layer's input projection is
            # batched into one (T*Bp, H) x (H, H) matmul + one bias broadcast.
            seq = jnp.concatenate(outs, axis=0)                   # (T*Bp, H)
            pre = (jnp.dot(seq, w_ihr_ref[l], preferred_element_type=jnp.float32)
                   + b_ref[l + 1])

    o_ref[...] = h.astype(o_ref.dtype)


def rnn_last_output(x, w_ih0, w_ihr, w_hh_stk, b_stk):
    """x: (B, T, IN) float32 -> (B, H) float32 (== output[:, -1, :] of the torch RNN)."""
    B, T, IN = x.shape
    H = w_hh_stk.shape[-1]

    # Pad batch to a multiple of 8 so per-timestep row slabs are sublane-tile aligned.
    Bp = ((B + 7) // 8) * 8
    if Bp != B:
        x = jnp.pad(x, ((0, Bp - B), (0, 0), (0, 0)))

    # Time-major, flattened to (T*Bp, IN) — layout glue stays outside the kernel.
    x_flat = jnp.transpose(x, (1, 0, 2)).reshape(T * Bp, IN)

    out = pl.pallas_call(
        rnn_kernel,
        out_shape=jax.ShapeDtypeStruct((Bp, H), jnp.float32),
        in_specs=[pl.BlockSpec(memory_space=pltpu.MemorySpace.VMEM)] * 5,
        out_specs=pl.BlockSpec(memory_space=pltpu.MemorySpace.VMEM),
        # TODO(synk): at realistic batch sizes, add a "parallel" batch grid axis
        # (row tiles >= 8) so v7x's second TensorCore is used; moot at toy B.
    )(x_flat, w_ih0, w_ihr, w_hh_stk, b_stk)
    return out[:B]


def init_params(key):
    """Deterministic PyTorch-style init: U(-1/sqrt(H), 1/sqrt(H)) for each tensor."""
    k = 1.0 / jnp.sqrt(jnp.float32(HIDDEN_SIZE))
    layers = []
    for l in range(NUM_LAYERS):
        in_dim = INPUT_SIZE if l == 0 else HIDDEN_SIZE
        key, k1, k2, k3, k4 = jax.random.split(key, 5)
        w_ih = jax.random.uniform(k1, (HIDDEN_SIZE, in_dim), jnp.float32, -k, k)
        w_hh = jax.random.uniform(k2, (HIDDEN_SIZE, HIDDEN_SIZE), jnp.float32, -k, k)
        b_ih = jax.random.uniform(k3, (HIDDEN_SIZE,), jnp.float32, -k, k)
        b_hh = jax.random.uniform(k4, (HIDDEN_SIZE,), jnp.float32, -k, k)
        layers.append((w_ih, w_hh, b_ih, b_hh))

    # Kernel-side layouts: weights pre-transposed so matmuls are (rows, in) @ (in, H).
    w_ih0 = layers[0][0].T                                              # (IN, H)
    w_ihr = jnp.stack([layers[l][0].T for l in range(1, NUM_LAYERS)])   # (L-1, H, H)
    w_hh_stk = jnp.stack([w_hh.T for (_, w_hh, _, _) in layers])        # (L, H, H)
    b_stk = jnp.stack([(b_ih + b_hh)[None, :]
                       for (_, _, b_ih, b_hh) in layers])               # (L, 1, H)
    return layers, w_ih0, w_ihr, w_hh_stk, b_stk


def rnn_reference(x, layers):
    """Pure-JAX reference matching torch.nn.RNN(tanh, num_layers=5, batch_first)."""
    B, T, _ = x.shape
    inp = x
    for (w_ih, w_hh, b_ih, b_hh) in layers:
        h = jnp.zeros((B, HIDDEN_SIZE), jnp.float32)
        outs = []
        for t in range(T):
            h = jnp.tanh(inp[:, t] @ w_ih.T + b_ih + h @ w_hh.T + b_hh)
            outs.append(h)
        inp = jnp.stack(outs, axis=1)
    return inp[:, -1, :]


if __name__ == "__main__":
    key = jax.random.PRNGKey(0)
    key, xkey, pkey = jax.random.split(key, 3)

    B, T = 4, 8
    x = jax.random.normal(xkey, (B, T, INPUT_SIZE), jnp.float32)

    layers, w_ih0, w_ihr, w_hh_stk, b_stk = init_params(pkey)

    out = rnn_last_output(x, w_ih0, w_ihr, w_hh_stk, b_stk)
    out = jax.block_until_ready(out)

    ref = rnn_reference(x, layers)
    assert out.shape == (B, HIDDEN_SIZE)
    assert jnp.allclose(out, ref, atol=1e-5, rtol=1e-5), "kernel/reference mismatch"

    print("KERNEL_OK")
</pallas_src>

<mosaic_0001>
module attributes {stable_mosaic.version = 11 : i64} {
  func.func @rnn_kernel(%arg0: memref<64x64xf32, #tpu.memory_space<vmem>>, %arg1: memref<64x40xf32, #tpu.memory_space<vmem>>, %arg2: memref<4x40x40xf32, #tpu.memory_space<vmem>>, %arg3: memref<5x40x40xf32, #tpu.memory_space<vmem>>, %arg4: memref<5x1x40xf32, #tpu.memory_space<vmem>>, %arg5: memref<8x40xf32, #tpu.memory_space<vmem>>) attributes {dimension_semantics = [], scalar_prefetch = 0 : i64, scratch_operands = 0 : i64, tpu.core_type = #tpu.core_type<tc>} {
    %c0 = arith.constant 0 : index
    %c0_0 = arith.constant 0 : index
    %0 = vector.load %arg0[%c0, %c0_0] : memref<64x64xf32, #tpu.memory_space<vmem>>, vector<64x64xf32>
    %c0_1 = arith.constant 0 : index
    %c0_2 = arith.constant 0 : index
    %1 = vector.load %arg1[%c0_1, %c0_2] : memref<64x40xf32, #tpu.memory_space<vmem>>, vector<64x40xf32>
    %cst = arith.constant dense<0.000000e+00> : vector<64x40xf32>
    %2 = tpu.matmul %0, %1, %cst {dimension_numbers = #tpu.dot_dimension_numbers<[1], [0], [0], [1], [0, 0, 1, 1], [], []>} : vector<64x64xf32>, vector<64x40xf32>, vector<64x40xf32> -> vector<64x40xf32>
    %c0_3 = arith.constant 0 : index
    %c0_4 = arith.constant 0 : index
    %c0_5 = arith.constant 0 : index
    %3 = vector.load %arg4[%c0_3, %c0_4, %c0_5] : memref<5x1x40xf32, #tpu.memory_space<vmem>>, vector<1x1x40xf32>
    %4 = vector.shape_cast %3 : vector<1x1x40xf32> to vector<1x40xf32>
    %5 = vector.broadcast %4 : vector<1x40xf32> to vector<64x40xf32>
    %6 = arith.addf %2, %5 : vector<64x40xf32>
    %c0_6 = arith.constant 0 : index
    %c0_7 = arith.constant 0 : index
    %c0_8 = arith.constant 0 : index
    %7 = vector.load %arg3[%c0_6, %c0_7, %c0_8] : memref<5x40x40xf32, #tpu.memory_space<vmem>>, vector<1x40x40xf32>
    %8 = vector.shape_cast %7 : vector<1x40x40xf32> to vector<40x40xf32>
    %cst_9 = arith.constant 0.000000e+00 : f32
    %9 = vector.broadcast %cst_9 : f32 to vector<8x40xf32>
    %10 = vector.extract_strided_slice %6 {offsets = [0, 0], sizes = [8, 40], strides = [1, 1]} : vector<64x40xf32> to vector<8x40xf32>
    %cst_10 = arith.constant dense<0.000000e+00> : vector<8x40xf32>
    %11 = tpu.matmul %9, %8, %cst_10 {dimension_numbers = #tpu.dot_dimension_numbers<[1], [0], [0], [1], [0, 0, 1, 1], [], []>} : vector<8x40xf32>, vector<40x40xf32>, vector<8x40xf32> -> vector<8x40xf32>
    %12 = arith.addf %10, %11 : vector<8x40xf32>
    %13 = math.tanh %12 : vector<8x40xf32>
    %14 = vector.extract_strided_slice %6 {offsets = [8, 0], sizes = [8, 40], strides = [1, 1]} : vector<64x40xf32> to vector<8x40xf32>
    %cst_11 = arith.constant dense<0.000000e+00> : vector<8x40xf32>
    %15 = tpu.matmul %13, %8, %cst_11 {dimension_numbers = #tpu.dot_dimension_numbers<[1], [0], [0], [1], [0, 0, 1, 1], [], []>} : vector<8x40xf32>, vector<40x40xf32>, vector<8x40xf32> -> vector<8x40xf32>
    %16 = arith.addf %14, %15 : vector<8x40xf32>
    %17 = math.tanh %16 : vector<8x40xf32>
    %18 = vector.extract_strided_slice %6 {offsets = [16, 0], sizes = [8, 40], strides = [1, 1]} : vector<64x40xf32> to vector<8x40xf32>
    %cst_12 = arith.constant dense<0.000000e+00> : vector<8x40xf32>
    %19 = tpu.matmul %17, %8, %cst_12 {dimension_numbers = #tpu.dot_dimension_numbers<[1], [0], [0], [1], [0, 0, 1, 1], [], []>} : vector<8x40xf32>, vector<40x40xf32>, vector<8x40xf32> -> vector<8x40xf32>
    %20 = arith.addf %18, %19 : vector<8x40xf32>
    %21 = math.tanh %20 : vector<8x40xf32>
    %22 = vector.extract_strided_slice %6 {offsets = [24, 0], sizes = [8, 40], strides = [1, 1]} : vector<64x40xf32> to vector<8x40xf32>
    %cst_13 = arith.constant dense<0.000000e+00> : vector<8x40xf32>
    %23 = tpu.matmul %21, %8, %cst_13 {dimension_numbers = #tpu.dot_dimension_numbers<[1], [0], [0], [1], [0, 0, 1, 1], [], []>} : vector<8x40xf32>, vector<40x40xf32>, vector<8x40xf32> -> vector<8x40xf32>
    %24 = arith.addf %22, %23 : vector<8x40xf32>
    %25 = math.tanh %24 : vector<8x40xf32>
    %26 = vector.extract_strided_slice %6 {offsets = [32, 0], sizes = [8, 40], strides = [1, 1]} : vector<64x40xf32> to vector<8x40xf32>
    %cst_14 = arith.constant dense<0.000000e+00> : vector<8x40xf32>
    %27 = tpu.matmul %25, %8, %cst_14 {dimension_numbers = #tpu.dot_dimension_numbers<[1], [0], [0], [1], [0, 0, 1, 1], [], []>} : vector<8x40xf32>, vector<40x40xf32>, vector<8x40xf32> -> vector<8x40xf32>
    %28 = arith.addf %26, %27 : vector<8x40xf32>
    %29 = math.tanh %28 : vector<8x40xf32>
    %30 = vector.extract_strided_slice %6 {offsets = [40, 0], sizes = [8, 40], strides = [1, 1]} : vector<64x40xf32> to vector<8x40xf32>
    %cst_15 = arith.constant dense<0.000000e+00> : vector<8x40xf32>
    %31 = tpu.matmul %29, %8, %cst_15 {dimension_numbers = #tpu.dot_dimension_numbers<[1], [0], [0], [1], [0, 0, 1, 1], [], []>} : vector<8x40xf32>, vector<40x40xf32>, vector<8x40xf32> -> vector<8x40xf32>
    %32 = arith.addf %30, %31 : vector<8x40xf32>
    %33 = math.tanh %32 : vector<8x40xf32>
    %34 = vector.extract_strided_slice %6 {offsets = [48, 0], sizes = [8, 40], strides = [1, 1]} : vector<64x40xf32> to vector<8x40xf32>
    %cst_16 = arith.constant dense<0.000000e+00> : vector<8x40xf32>
    %35 = tpu.matmul %33, %8, %cst_16 {dimension_numbers = #tpu.dot_dimension_numbers<[1], [0], [0], [1], [0, 0, 1, 1], [], []>} : vector<8x40xf32>, vector<40x40xf32>, vector<8x40xf32> -> vector<8x40xf32>
    %36 = arith.addf %34, %35 : vector<8x40xf32>
    %37 = math.tanh %36 : vector<8x40xf32>
    %38 = vector.extract_strided_slice %6 {offsets = [56, 0], sizes = [8, 40], strides = [1, 1]} : vector<64x40xf32> to vector<8x40xf32>
    %cst_17 = arith.constant dense<0.000000e+00> : vector<8x40xf32>
    %39 = tpu.matmul %37, %8, %cst_17 {dimension_numbers = #tpu.dot_dimension_numbers<[1], [0], [0], [1], [0, 0, 1, 1], [], []>} : vector<8x40xf32>, vector<40x40xf32>, vector<8x40xf32> -> vector<8x40xf32>
    %40 = arith.addf %38, %39 : vector<8x40xf32>
    %41 = math.tanh %40 : vector<8x40xf32>
    %42 = tpu.concatenate %13, %17, %21, %25, %29, %33, %37, %41 in 0 : vector<8x40xf32>, vector<8x40xf32>, vector<8x40xf32>, vector<8x40xf32>, vector<8x40xf32>, vector<8x40xf32>, vector<8x40xf32>, vector<8x40xf32> -> vector<64x40xf32>
    %c0_18 = arith.constant 0 : index
    %c0_19 = arith.constant 0 : index
    %c0_20 = arith.constant 0 : index
    %43 = vector.load %arg2[%c0_18, %c0_19, %c0_20] : memref<4x40x40xf32, #tpu.memory_space<vmem>>, vector<1x40x40xf32>
    %44 = vector.shape_cast %43 : vector<1x40x40xf32> to vector<40x40xf32>
    %cst_21 = arith.constant dense<0.000000e+00> : vector<64x40xf32>
    %45 = tpu.matmul %42, %44, %cst_21 {dimension_numbers = #tpu.dot_dimension_numbers<[1], [0], [0], [1], [0, 0, 1, 1], [], []>} : vector<64x40xf32>, vector<40x40xf32>, vector<64x40xf32> -> vector<64x40xf32>
    %c1 = arith.constant 1 : index
    %c0_22 = arith.constant 0 : index
    %c0_23 = arith.constant 0 : index
    %46 = vector.load %arg4[%c1, %c0_22, %c0_23] : memref<5x1x40xf32, #tpu.memory_space<vmem>>, vector<1x1x40xf32>
    %47 = vector.shape_cast %46 : vector<1x1x40xf32> to vector<1x40xf32>
    %48 = vector.broadcast %47 : vector<1x40xf32> to vector<64x40xf32>
    %49 = arith.addf %45, %48 : vector<64x40xf32>
    %c1_24 = arith.constant 1 : index
    %c0_25 = arith.constant 0 : index
    %c0_26 = arith.constant 0 : index
    %50 = vector.load %arg3[%c1_24, %c0_25, %c0_26] : memref<5x40x40xf32, #tpu.memory_space<vmem>>, vector<1x40x40xf32>
    %51 = vector.shape_cast %50 : vector<1x40x40xf32> to vector<40x40xf32>
    %cst_27 = arith.constant 0.000000e+00 : f32
    %52 = vector.broadcast %cst_27 : f32 to vector<8x40xf32>
    %53 = vector.extract_strided_slice %49 {offsets = [0, 0], sizes = [8, 40], strides = [1, 1]} : vector<64x40xf32> to vector<8x40xf32>
    %cst_28 = arith.constant dense<0.000000e+00> : vector<8x40xf32>
    %54 = tpu.matmul %52, %51, %cst_28 {dimension_numbers = #tpu.dot_dimension_numbers<[1], [0], [0], [1], [0, 0, 1, 1], [], []>} : vector<8x40xf32>, vector<40x40xf32>, vector<8x40xf32> -> vector<8x40xf32>
    %55 = arith.addf %53, %54 : vector<8x40xf32>
    %56 = math.tanh %55 : vector<8x40xf32>
    %57 = vector.extract_strided_slice %49 {offsets = [8, 0], sizes = [8, 40], strides = [1, 1]} : vector<64x40xf32> to vector<8x40xf32>
    %cst_29 = arith.constant dense<0.000000e+00> : vector<8x40xf32>
    %58 = tpu.matmul %56, %51, %cst_29 {dimension_numbers = #tpu.dot_dimension_numbers<[1], [0], [0], [1], [0, 0, 1, 1], [], []>} : vector<8x40xf32>, vector<40x40xf32>, vector<8x40xf32> -> vector<8x40xf32>
    %59 = arith.addf %57, %58 : vector<8x40xf32>
    %60 = math.tanh %59 : vector<8x40xf32>
    %61 = vector.extract_strided_slice %49 {offsets = [16, 0], sizes = [8, 40], strides = [1, 1]} : vector<64x40xf32> to vector<8x40xf32>
    %cst_30 = arith.constant dense<0.000000e+00> : vector<8x40xf32>
    %62 = tpu.matmul %60, %51, %cst_30 {dimension_numbers = #tpu.dot_dimension_numbers<[1], [0], [0], [1], [0, 0, 1, 1], [], []>} : vector<8x40xf32>, vector<40x40xf32>, vector<8x40xf32> -> vector<8x40xf32>
    %63 = arith.addf %61, %62 : vector<8x40xf32>
    %64 = math.tanh %63 : vector<8x40xf32>
    %65 = vector.extract_strided_slice %49 {offsets = [24, 0], sizes = [8, 40], strides = [1, 1]} : vector<64x40xf32> to vector<8x40xf32>
    %cst_31 = arith.constant dense<0.000000e+00> : vector<8x40xf32>
    %66 = tpu.matmul %64, %51, %cst_31 {dimension_numbers = #tpu.dot_dimension_numbers<[1], [0], [0], [1], [0, 0, 1, 1], [], []>} : vector<8x40xf32>, vector<40x40xf32>, vector<8x40xf32> -> vector<8x40xf32>
    %67 = arith.addf %65, %66 : vector<8x40xf32>
    %68 = math.tanh %67 : vector<8x40xf32>
    %69 = vector.extract_strided_slice %49 {offsets = [32, 0], sizes = [8, 40], strides = [1, 1]} : vector<64x40xf32> to vector<8x40xf32>
    %cst_32 = arith.constant dense<0.000000e+00> : vector<8x40xf32>
    %70 = tpu.matmul %68, %51, %cst_32 {dimension_numbers = #tpu.dot_dimension_numbers<[1], [0], [0], [1], [0, 0, 1, 1], [], []>} : vector<8x40xf32>, vector<40x40xf32>, vector<8x40xf32> -> vector<8x40xf32>
    %71 = arith.addf %69, %70 : vector<8x40xf32>
    %72 = math.tanh %71 : vector<8x40xf32>
    %73 = vector.extract_strided_slice %49 {offsets = [40, 0], sizes = [8, 40], strides = [1, 1]} : vector<64x40xf32> to vector<8x40xf32>
    %cst_33 = arith.constant dense<0.000000e+00> : vector<8x40xf32>
    %74 = tpu.matmul %72, %51, %cst_33 {dimension_numbers = #tpu.dot_dimension_numbers<[1], [0], [0], [1], [0, 0, 1, 1], [], []>} : vector<8x40xf32>, vector<40x40xf32>, vector<8x40xf32> -> vector<8x40xf32>
    %75 = arith.addf %73, %74 : vector<8x40xf32>
    %76 = math.tanh %75 : vector<8x40xf32>
    %77 = vector.extract_strided_slice %49 {offsets = [48, 0], sizes = [8, 40], strides = [1, 1]} : vector<64x40xf32> to vector<8x40xf32>
    %cst_34 = arith.constant dense<0.000000e+00> : vector<8x40xf32>
    %78 = tpu.matmul %76, %51, %cst_34 {dimension_numbers = #tpu.dot_dimension_numbers<[1], [0], [0], [1], [0, 0, 1, 1], [], []>} : vector<8x40xf32>, vector<40x40xf32>, vector<8x40xf32> -> vector<8x40xf32>
    %79 = arith.addf %77, %78 : vector<8x40xf32>
    %80 = math.tanh %79 : vector<8x40xf32>
    %81 = vector.extract_strided_slice %49 {offsets = [56, 0], sizes = [8, 40], strides = [1, 1]} : vector<64x40xf32> to vector<8x40xf32>
    %cst_35 = arith.constant dense<0.000000e+00> : vector<8x40xf32>
    %82 = tpu.matmul %80, %51, %cst_35 {dimension_numbers = #tpu.dot_dimension_numbers<[1], [0], [0], [1], [0, 0, 1, 1], [], []>} : vector<8x40xf32>, vector<40x40xf32>, vector<8x40xf32> -> vector<8x40xf32>
    %83 = arith.addf %81, %82 : vector<8x40xf32>
    %84 = math.tanh %83 : vector<8x40xf32>
    %85 = tpu.concatenate %56, %60, %64, %68, %72, %76, %80, %84 in 0 : vector<8x40xf32>, vector<8x40xf32>, vector<8x40xf32>, vector<8x40xf32>, vector<8x40xf32>, vector<8x40xf32>, vector<8x40xf32>, vector<8x40xf32> -> vector<64x40xf32>
    %c1_36 = arith.constant 1 : index
    %c0_37 = arith.constant 0 : index
    %c0_38 = arith.constant 0 : index
    %86 = vector.load %arg2[%c1_36, %c0_37, %c0_38] : memref<4x40x40xf32, #tpu.memory_space<vmem>>, vector<1x40x40xf32>
    %87 = vector.shape_cast %86 : vector<1x40x40xf32> to vector<40x40xf32>
    %cst_39 = arith.constant dense<0.000000e+00> : vector<64x40xf32>
    %88 = tpu.matmul %85, %87, %cst_39 {dimension_numbers = #tpu.dot_dimension_numbers<[1], [0], [0], [1], [0, 0, 1, 1], [], []>} : vector<64x40xf32>, vector<40x40xf32>, vector<64x40xf32> -> vector<64x40xf32>
    %c2 = arith.constant 2 : index
    %c0_40 = arith.constant 0 : index
    %c0_41 = arith.constant 0 : index
    %89 = vector.load %arg4[%c2, %c0_40, %c0_41] : memref<5x1x40xf32, #tpu.memory_space<vmem>>, vector<1x1x40xf32>
    %90 = vector.shape_cast %89 : vector<1x1x40xf32> to vector<1x40xf32>
    %91 = vector.broadcast %90 : vector<1x40xf32> to vector<64x40xf32>
    %92 = arith.addf %88, %91 : vector<64x40xf32>
    %c2_42 = arith.constant 2 : index
    %c0_43 = arith.constant 0 : index
    %c0_44 = arith.constant 0 : index
    %93 = vector.load %arg3[%c2_42, %c0_43, %c0_44] : memref<5x40x40xf32, #tpu.memory_space<vmem>>, vector<1x40x40xf32>
    %94 = vector.shape_cast %93 : vector<1x40x40xf32> to vector<40x40xf32>
    %cst_45 = arith.constant 0.000000e+00 : f32
    %95 = vector.broadcast %cst_45 : f32 to vector<8x40xf32>
    %96 = vector.extract_strided_slice %92 {offsets = [0, 0], sizes = [8, 40], strides = [1, 1]} : vector<64x40xf32> to vector<8x40xf32>
    %cst_46 = arith.constant dense<0.000000e+00> : vector<8x40xf32>
    %97 = tpu.matmul %95, %94, %cst_46 {dimension_numbers = #tpu.dot_dimension_numbers<[1], [0], [0], [1], [0, 0, 1, 1], [], []>} : vector<8x40xf32>, vector<40x40xf32>, vector<8x40xf32> -> vector<8x40xf32>
    %98 = arith.addf %96, %97 : vector<8x40xf32>
    %99 = math.tanh %98 : vector<8x40xf32>
    %100 = vector.extract_strided_slice %92 {offsets = [8, 0], sizes = [8, 40], strides = [1, 1]} : vector<64x40xf32> to vector<8x40xf32>
    %cst_47 = arith.constant dense<0.000000e+00> : vector<8x40xf32>
    %101 = tpu.matmul %99, %94, %cst_47 {dimension_numbers = #tpu.dot_dimension_numbers<[1], [0], [0], [1], [0, 0, 1, 1], [], []>} : vector<8x40xf32>, vector<40x40xf32>, vector<8x40xf32> -> vector<8x40xf32>
    %102 = arith.addf %100, %101 : vector<8x40xf32>
    %103 = math.tanh %102 : vector<8x40xf32>
    %104 = vector.extract_strided_slice %92 {offsets = [16, 0], sizes = [8, 40], strides = [1, 1]} : vector<64x40xf32> to vector<8x40xf32>
    %cst_48 = arith.constant dense<0.000000e+00> : vector<8x40xf32>
    %105 = tpu.matmul %103, %94, %cst_48 {dimension_numbers = #tpu.dot_dimension_numbers<[1], [0], [0], [1], [0, 0, 1, 1], [], []>} : vector<8x40xf32>, vector<40x40xf32>, vector<8x40xf32> -> vector<8x40xf32>
    %106 = arith.addf %104, %105 : vector<8x40xf32>
    %107 = math.tanh %106 : vector<8x40xf32>
    %108 = vector.extract_strided_slice %92 {offsets = [24, 0], sizes = [8, 40], strides = [1, 1]} : vector<64x40xf32> to vector<8x40xf32>
    %cst_49 = arith.constant dense<0.000000e+00> : vector<8x40xf32>
    %109 = tpu.matmul %107, %94, %cst_49 {dimension_numbers = #tpu.dot_dimension_numbers<[1], [0], [0], [1], [0, 0, 1, 1], [], []>} : vector<8x40xf32>, vector<40x40xf32>, vector<8x40xf32> -> vector<8x40xf32>
    %110 = arith.addf %108, %109 : vector<8x40xf32>
    %111 = math.tanh %110 : vector<8x40xf32>
    %112 = vector.extract_strided_slice %92 {offsets = [32, 0], sizes = [8, 40], strides = [1, 1]} : vector<64x40xf32> to vector<8x40xf32>
    %cst_50 = arith.constant dense<0.000000e+00> : vector<8x40xf32>
    %113 = tpu.matmul %111, %94, %cst_50 {dimension_numbers = #tpu.dot_dimension_numbers<[1], [0], [0], [1], [0, 0, 1, 1], [], []>} : vector<8x40xf32>, vector<40x40xf32>, vector<8x40xf32> -> vector<8x40xf32>
    %114 = arith.addf %112, %113 : vector<8x40xf32>
    %115 = math.tanh %114 : vector<8x40xf32>
    %116 = vector.extract_strided_slice %92 {offsets = [40, 0], sizes = [8, 40], strides = [1, 1]} : vector<64x40xf32> to vector<8x40xf32>
    %cst_51 = arith.constant dense<0.000000e+00> : vector<8x40xf32>
    %117 = tpu.matmul %115, %94, %cst_51 {dimension_numbers = #tpu.dot_dimension_numbers<[1], [0], [0], [1], [0, 0, 1, 1], [], []>} : vector<8x40xf32>, vector<40x40xf32>, vector<8x40xf32> -> vector<8x40xf32>
    %118 = arith.addf %116, %117 : vector<8x40xf32>
    %119 = math.tanh %118 : vector<8x40xf32>
    %120 = vector.extract_strided_slice %92 {offsets = [48, 0], sizes = [8, 40], strides = [1, 1]} : vector<64x40xf32> to vector<8x40xf32>
    %cst_52 = arith.constant dense<0.000000e+00> : vector<8x40xf32>
    %121 = tpu.matmul %119, %94, %cst_52 {dimension_numbers = #tpu.dot_dimension_numbers<[1], [0], [0], [1], [0, 0, 1, 1], [], []>} : vector<8x40xf32>, vector<40x40xf32>, vector<8x40xf32> -> vector<8x40xf32>
    %122 = arith.addf %120, %121 : vector<8x40xf32>
    %123 = math.tanh %122 : vector<8x40xf32>
    %124 = vector.extract_strided_slice %92 {offsets = [56, 0], sizes = [8, 40], strides = [1, 1]} : vector<64x40xf32> to vector<8x40xf32>
    %cst_53 = arith.constant dense<0.000000e+00> : vector<8x40xf32>
    %125 = tpu.matmul %123, %94, %cst_53 {dimension_numbers = #tpu.dot_dimension_numbers<[1], [0], [0], [1], [0, 0, 1, 1], [], []>} : vector<8x40xf32>, vector<40x40xf32>, vector<8x40xf32> -> vector<8x40xf32>
    %126 = arith.addf %124, %125 : vector<8x40xf32>
    %127 = math.tanh %126 : vector<8x40xf32>
    %128 = tpu.concatenate %99, %103, %107, %111, %115, %119, %123, %127 in 0 : vector<8x40xf32>, vector<8x40xf32>, vector<8x40xf32>, vector<8x40xf32>, vector<8x40xf32>, vector<8x40xf32>, vector<8x40xf32>, vector<8x40xf32> -> vector<64x40xf32>
    %c2_54 = arith.constant 2 : index
    %c0_55 = arith.constant 0 : index
    %c0_56 = arith.constant 0 : index
    %129 = vector.load %arg2[%c2_54, %c0_55, %c0_56] : memref<4x40x40xf32, #tpu.memory_space<vmem>>, vector<1x40x40xf32>
    %130 = vector.shape_cast %129 : vector<1x40x40xf32> to vector<40x40xf32>
    %cst_57 = arith.constant dense<0.000000e+00> : vector<64x40xf32>
    %131 = tpu.matmul %128, %130, %cst_57 {dimension_numbers = #tpu.dot_dimension_numbers<[1], [0], [0], [1], [0, 0, 1, 1], [], []>} : vector<64x40xf32>, vector<40x40xf32>, vector<64x40xf32> -> vector<64x40xf32>
    %c3 = arith.constant 3 : index
    %c0_58 = arith.constant 0 : index
    %c0_59 = arith.constant 0 : index
    %132 = vector.load %arg4[%c3, %c0_58, %c0_59] : memref<5x1x40xf32, #tpu.memory_space<vmem>>, vector<1x1x40xf32>
    %133 = vector.shape_cast %132 : vector<1x1x40xf32> to vector<1x40xf32>
    %134 = vector.broadcast %133 : vector<1x40xf32> to vector<64x40xf32>
    %135 = arith.addf %131, %134 : vector<64x40xf32>
    %c3_60 = arith.constant 3 : index
    %c0_61 = arith.constant 0 : index
    %c0_62 = arith.constant 0 : index
    %136 = vector.load %arg3[%c3_60, %c0_61, %c0_62] : memref<5x40x40xf32, #tpu.memory_space<vmem>>, vector<1x40x40xf32>
    %137 = vector.shape_cast %136 : vector<1x40x40xf32> to vector<40x40xf32>
    %cst_63 = arith.constant 0.000000e+00 : f32
    %138 = vector.broadcast %cst_63 : f32 to vector<8x40xf32>
    %139 = vector.extract_strided_slice %135 {offsets = [0, 0], sizes = [8, 40], strides = [1, 1]} : vector<64x40xf32> to vector<8x40xf32>
    %cst_64 = arith.constant dense<0.000000e+00> : vector<8x40xf32>
    %140 = tpu.matmul %138, %137, %cst_64 {dimension_numbers = #tpu.dot_dimension_numbers<[1], [0], [0], [1], [0, 0, 1, 1], [], []>} : vector<8x40xf32>, vector<40x40xf32>, vector<8x40xf32> -> vector<8x40xf32>
    %141 = arith.addf %139, %140 : vector<8x40xf32>
    %142 = math.tanh %141 : vector<8x40xf32>
    %143 = vector.extract_strided_slice %135 {offsets = [8, 0], sizes = [8, 40], strides = [1, 1]} : vector<64x40xf32> to vector<8x40xf32>
    %cst_65 = arith.constant dense<0.000000e+00> : vector<8x40xf32>
    %144 = tpu.matmul %142, %137, %cst_65 {dimension_numbers = #tpu.dot_dimension_numbers<[1], [0], [0], [1], [0, 0, 1, 1], [], []>} : vector<8x40xf32>, vector<40x40xf32>, vector<8x40xf32> -> vector<8x40xf32>
    %145 = arith.addf %143, %144 : vector<8x40xf32>
    %146 = math.tanh %145 : vector<8x40xf32>
    %147 = vector.extract_strided_slice %135 {offsets = [16, 0], sizes = [8, 40], strides = [1, 1]} : vector<64x40xf32> to vector<8x40xf32>
    %cst_66 = arith.constant dense<0.000000e+00> : vector<8x40xf32>
    %148 = tpu.matmul %146, %137, %cst_66 {dimension_numbers = #tpu.dot_dimension_numbers<[1], [0], [0], [1], [0, 0, 1, 1], [], []>} : vector<8x40xf32>, vector<40x40xf32>, vector<8x40xf32> -> vector<8x40xf32>
    %149 = arith.addf %147, %148 : vector<8x40xf32>
    %150 = math.tanh %149 : vector<8x40xf32>
    %151 = vector.extract_strided_slice %135 {offsets = [24, 0], sizes = [8, 40], strides = [1, 1]} : vector<64x40xf32> to vector<8x40xf32>
    %cst_67 = arith.constant dense<0.000000e+00> : vector<8x40xf32>
    %152 = tpu.matmul %150, %137, %cst_67 {dimension_numbers = #tpu.dot_dimension_numbers<[1], [0], [0], [1], [0, 0, 1, 1], [], []>} : vector<8x40xf32>, vector<40x40xf32>, vector<8x40xf32> -> vector<8x40xf32>
    %153 = arith.addf %151, %152 : vector<8x40xf32>
    %154 = math.tanh %153 : vector<8x40xf32>
    %155 = vector.extract_strided_slice %135 {offsets = [32, 0], sizes = [8, 40], strides = [1, 1]} : vector<64x40xf32> to vector<8x40xf32>
    %cst_68 = arith.constant dense<0.000000e+00> : vector<8x40xf32>
    %156 = tpu.matmul %154, %137, %cst_68 {dimension_numbers = #tpu.dot_dimension_numbers<[1], [0], [0], [1], [0, 0, 1, 1], [], []>} : vector<8x40xf32>, vector<40x40xf32>, vector<8x40xf32> -> vector<8x40xf32>
    %157 = arith.addf %155, %156 : vector<8x40xf32>
    %158 = math.tanh %157 : vector<8x40xf32>
    %159 = vector.extract_strided_slice %135 {offsets = [40, 0], sizes = [8, 40], strides = [1, 1]} : vector<64x40xf32> to vector<8x40xf32>
    %cst_69 = arith.constant dense<0.000000e+00> : vector<8x40xf32>
    %160 = tpu.matmul %158, %137, %cst_69 {dimension_numbers = #tpu.dot_dimension_numbers<[1], [0], [0], [1], [0, 0, 1, 1], [], []>} : vector<8x40xf32>, vector<40x40xf32>, vector<8x40xf32> -> vector<8x40xf32>
    %161 = arith.addf %159, %160 : vector<8x40xf32>
    %162 = math.tanh %161 : vector<8x40xf32>
    %163 = vector.extract_strided_slice %135 {offsets = [48, 0], sizes = [8, 40], strides = [1, 1]} : vector<64x40xf32> to vector<8x40xf32>
    %cst_70 = arith.constant dense<0.000000e+00> : vector<8x40xf32>
    %164 = tpu.matmul %162, %137, %cst_70 {dimension_numbers = #tpu.dot_dimension_numbers<[1], [0], [0], [1], [0, 0, 1, 1], [], []>} : vector<8x40xf32>, vector<40x40xf32>, vector<8x40xf32> -> vector<8x40xf32>
    %165 = arith.addf %163, %164 : vector<8x40xf32>
    %166 = math.tanh %165 : vector<8x40xf32>
    %167 = vector.extract_strided_slice %135 {offsets = [56, 0], sizes = [8, 40], strides = [1, 1]} : vector<64x40xf32> to vector<8x40xf32>
    %cst_71 = arith.constant dense<0.000000e+00> : vector<8x40xf32>
    %168 = tpu.matmul %166, %137, %cst_71 {dimension_numbers = #tpu.dot_dimension_numbers<[1], [0], [0], [1], [0, 0, 1, 1], [], []>} : vector<8x40xf32>, vector<40x40xf32>, vector<8x40xf32> -> vector<8x40xf32>
    %169 = arith.addf %167, %168 : vector<8x40xf32>
    %170 = math.tanh %169 : vector<8x40xf32>
    %171 = tpu.concatenate %142, %146, %150, %154, %158, %162, %166, %170 in 0 : vector<8x40xf32>, vector<8x40xf32>, vector<8x40xf32>, vector<8x40xf32>, vector<8x40xf32>, vector<8x40xf32>, vector<8x40xf32>, vector<8x40xf32> -> vector<64x40xf32>
    %c3_72 = arith.constant 3 : index
    %c0_73 = arith.constant 0 : index
    %c0_74 = arith.constant 0 : index
    %172 = vector.load %arg2[%c3_72, %c0_73, %c0_74] : memref<4x40x40xf32, #tpu.memory_space<vmem>>, vector<1x40x40xf32>
    %173 = vector.shape_cast %172 : vector<1x40x40xf32> to vector<40x40xf32>
    %cst_75 = arith.constant dense<0.000000e+00> : vector<64x40xf32>
    %174 = tpu.matmul %171, %173, %cst_75 {dimension_numbers = #tpu.dot_dimension_numbers<[1], [0], [0], [1], [0, 0, 1, 1], [], []>} : vector<64x40xf32>, vector<40x40xf32>, vector<64x40xf32> -> vector<64x40xf32>
    %c4 = arith.constant 4 : index
    %c0_76 = arith.constant 0 : index
    %c0_77 = arith.constant 0 : index
    %175 = vector.load %arg4[%c4, %c0_76, %c0_77] : memref<5x1x40xf32, #tpu.memory_space<vmem>>, vector<1x1x40xf32>
    %176 = vector.shape_cast %175 : vector<1x1x40xf32> to vector<1x40xf32>
    %177 = vector.broadcast %176 : vector<1x40xf32> to vector<64x40xf32>
    %178 = arith.addf %174, %177 : vector<64x40xf32>
    %c4_78 = arith.constant 4 : index
    %c0_79 = arith.constant 0 : index
    %c0_80 = arith.constant 0 : index
    %179 = vector.load %arg3[%c4_78, %c0_79, %c0_80] : memref<5x40x40xf32, #tpu.memory_space<vmem>>, vector<1x40x40xf32>
    %180 = vector.shape_cast %179 : vector<1x40x40xf32> to vector<40x40xf32>
    %cst_81 = arith.constant 0.000000e+00 : f32
    %181 = vector.broadcast %cst_81 : f32 to vector<8x40xf32>
    %182 = vector.extract_strided_slice %178 {offsets = [0, 0], sizes = [8, 40], strides = [1, 1]} : vector<64x40xf32> to vector<8x40xf32>
    %cst_82 = arith.constant dense<0.000000e+00> : vector<8x40xf32>
    %183 = tpu.matmul %181, %180, %cst_82 {dimension_numbers = #tpu.dot_dimension_numbers<[1], [0], [0], [1], [0, 0, 1, 1], [], []>} : vector<8x40xf32>, vector<40x40xf32>, vector<8x40xf32> -> vector<8x40xf32>
    %184 = arith.addf %182, %183 : vector<8x40xf32>
    %185 = math.tanh %184 : vector<8x40xf32>
    %186 = vector.extract_strided_slice %178 {offsets = [8, 0], sizes = [8, 40], strides = [1, 1]} : vector<64x40xf32> to vector<8x40xf32>
    %cst_83 = arith.constant dense<0.000000e+00> : vector<8x40xf32>
    %187 = tpu.matmul %185, %180, %cst_83 {dimension_numbers = #tpu.dot_dimension_numbers<[1], [0], [0], [1], [0, 0, 1, 1], [], []>} : vector<8x40xf32>, vector<40x40xf32>, vector<8x40xf32> -> vector<8x40xf32>
    %188 = arith.addf %186, %187 : vector<8x40xf32>
    %189 = math.tanh %188 : vector<8x40xf32>
    %190 = vector.extract_strided_slice %178 {offsets = [16, 0], sizes = [8, 40], strides = [1, 1]} : vector<64x40xf32> to vector<8x40xf32>
    %cst_84 = arith.constant dense<0.000000e+00> : vector<8x40xf32>
    %191 = tpu.matmul %189, %180, %cst_84 {dimension_numbers = #tpu.dot_dimension_numbers<[1], [0], [0], [1], [0, 0, 1, 1], [], []>} : vector<8x40xf32>, vector<40x40xf32>, vector<8x40xf32> -> vector<8x40xf32>
    %192 = arith.addf %190, %191 : vector<8x40xf32>
    %193 = math.tanh %192 : vector<8x40xf32>
    %194 = vector.extract_strided_slice %178 {offsets = [24, 0], sizes = [8, 40], strides = [1, 1]} : vector<64x40xf32> to vector<8x40xf32>
    %cst_85 = arith.constant dense<0.000000e+00> : vector<8x40xf32>
    %195 = tpu.matmul %193, %180, %cst_85 {dimension_numbers = #tpu.dot_dimension_numbers<[1], [0], [0], [1], [0, 0, 1, 1], [], []>} : vector<8x40xf32>, vector<40x40xf32>, vector<8x40xf32> -> vector<8x40xf32>
    %196 = arith.addf %194, %195 : vector<8x40xf32>
    %197 = math.tanh %196 : vector<8x40xf32>
    %198 = vector.extract_strided_slice %178 {offsets = [32, 0], sizes = [8, 40], strides = [1, 1]} : vector<64x40xf32> to vector<8x40xf32>
    %cst_86 = arith.constant dense<0.000000e+00> : vector<8x40xf32>
    %199 = tpu.matmul %197, %180, %cst_86 {dimension_numbers = #tpu.dot_dimension_numbers<[1], [0], [0], [1], [0, 0, 1, 1], [], []>} : vector<8x40xf32>, vector<40x40xf32>, vector<8x40xf32> -> vector<8x40xf32>
    %200 = arith.addf %198, %199 : vector<8x40xf32>
    %201 = math.tanh %200 : vector<8x40xf32>
    %202 = vector.extract_strided_slice %178 {offsets = [40, 0], sizes = [8, 40], strides = [1, 1]} : vector<64x40xf32> to vector<8x40xf32>
    %cst_87 = arith.constant dense<0.000000e+00> : vector<8x40xf32>
    %203 = tpu.matmul %201, %180, %cst_87 {dimension_numbers = #tpu.dot_dimension_numbers<[1], [0], [0], [1], [0, 0, 1, 1], [], []>} : vector<8x40xf32>, vector<40x40xf32>, vector<8x40xf32> -> vector<8x40xf32>
    %204 = arith.addf %202, %203 : vector<8x40xf32>
    %205 = math.tanh %204 : vector<8x40xf32>
    %206 = vector.extract_strided_slice %178 {offsets = [48, 0], sizes = [8, 40], strides = [1, 1]} : vector<64x40xf32> to vector<8x40xf32>
    %cst_88 = arith.constant dense<0.000000e+00> : vector<8x40xf32>
    %207 = tpu.matmul %205, %180, %cst_88 {dimension_numbers = #tpu.dot_dimension_numbers<[1], [0], [0], [1], [0, 0, 1, 1], [], []>} : vector<8x40xf32>, vector<40x40xf32>, vector<8x40xf32> -> vector<8x40xf32>
    %208 = arith.addf %206, %207 : vector<8x40xf32>
    %209 = math.tanh %208 : vector<8x40xf32>
    %210 = vector.extract_strided_slice %178 {offsets = [56, 0], sizes = [8, 40], strides = [1, 1]} : vector<64x40xf32> to vector<8x40xf32>
    %cst_89 = arith.constant dense<0.000000e+00> : vector<8x40xf32>
    %211 = tpu.matmul %209, %180, %cst_89 {dimension_numbers = #tpu.dot_dimension_numbers<[1], [0], [0], [1], [0, 0, 1, 1], [], []>} : vector<8x40xf32>, vector<40x40xf32>, vector<8x40xf32> -> vector<8x40xf32>
    %212 = arith.addf %210, %211 : vector<8x40xf32>
    %213 = math.tanh %212 : vector<8x40xf32>
    %c0_90 = arith.constant 0 : index
    %c0_91 = arith.constant 0 : index
    %214 = vector.load %arg5[%c0_90, %c0_91] : memref<8x40xf32, #tpu.memory_space<vmem>>, vector<8x40xf32>
    tpu.vector_store %arg5[%c0_90, %c0_91], %213 {strides = array<i32>} : memref<8x40xf32, #tpu.memory_space<vmem>>, vector<8x40xf32>,
    return
  }
}

</mosaic_0001>

<bundles_post_ra>
// kernel: tpu_custom_call.1
= control target key start
LH: loop header
LB: loop body
LE: loop exit
PB: predicated region body
PF: predicated region fallthrough
CT: control target
= control target key end

     0   :  { %10 = vsyncpa [#allocation3], 0  ;;  %s2098_s0 = inlined_call_operand.vmem [shape: f32[64,64], index: 0, kind: input, shape index: {}]   ;;  %s2099_s1 = inlined_call_operand.vmem [shape: f32[64,40], index: 1, kind: input, shape index: {}]   ;;  %s2100_s2 = inlined_call_operand.hbm [shape: f32[4,40,40], index: 2, kind: input, shape index: {}]   ;;  %s2101_s3 = inlined_call_operand.hbm [shape: f32[5,40,40], index: 3, kind: input, shape index: {}]   ;;  %s2102_s4 = inlined_call_operand.vmem [shape: f32[5,1,40], index: 4, kind: input, shape index: {}]   ;;  %s2103_s5 = inlined_call_operand.hbm [shape: f32[8,40], index: 5, kind: output, shape index: {}]  }
   0x1   :  { %11 = vsyncpa [#allocation6], 0 }
   0x2   :  { %12 = vsyncpa [#allocation4], 0  ;;  %s21_s20 = sshll.u32 %s2100_s2, 4  ;;  %s1643_s21 = smov [#allocation2]   ;;  %s22_s20 = int_to_ptr.hbm [resolvable:$true] %s21_s20 }
   0x3   :  { %s23_s22 = sshll.u32 %s1643_s21, 4  ;;  %s34_s25 = sshll.u32 %s2101_s3, 4  ;;  %s24_s22 = int_to_ptr.vmem [resolvable:$true] %s23_s22  ;;  %s35_s25 = int_to_ptr.hbm [resolvable:$true] %s34_s25 }
   0x4   :  { %s1644_s26 = smov 128   ;;  %s1645_s27 = smov 8  }
   0x5   :  { %29 = dma.hbm_to_vmem [thread:$0]  %s22_s20, 2560, %s24_s22, [#allocation3], %s1644_s26, %s1644_s26, %s1645_s27  }
   0x6   :  { %s1646_s28 = smov [#allocation5]  }
   0x7   :  { %s36_s29 = sshll.u32 %s1646_s28, 4  ;;  %s37_s29 = int_to_ptr.vmem [resolvable:$true] %s36_s29 }
   0x8   :  { %42 = dma.hbm_to_vmem [thread:$0]  %s35_s25, 3200, %s37_s29, [#allocation6], %s1644_s26, %s1644_s26, %s1645_s27  }
   0x9   :  { %1637 = dma.done.wait [#allocation3], 2560  }
   0xa   :  { %1638 = vsyncadd [#allocation3], 4294964736 }
   0xb   :  { %1639 = dma.done.wait [#allocation6], 3200  }
   0xc   :  { %1640 = vsyncadd [#allocation6], 4294964096  ;;  %v68_v0 = vld [vmem:[%s2099_s1 + $0x38] sm:$0xff]  ;;  %v67_v1 = vld [vmem:[%s2099_s1 + $0x30] sm:$0xff]  ;;  %v1647_v12 = vmov 0.0   ;;  %vm73_vm0 = vcmask 523264  }
   0xd   :  { %106 = vmatpush.msra.mxu0 %v68_v0  ;;  %v1691_v2 = vld [vmem:[#allocation5 + $0x20] sm:$0xff]  ;;  %v66_v3 = vld [vmem:[%s2099_s1 + $0x28] sm:$0xff]  ;;  %v1697_v4 = vld [vmem:[#allocation5 + $0x18] sm:$0xff]  ;;  %vm144_vm1 = vcmask 326656   ;;  %s1384_s19 = sshll.u32 %s2103_s5, 4  ;;  %s1385_s19 = int_to_ptr.hbm [resolvable:$true] %s1384_s19 }
   0xe   :  { %159 = vmatpush.msra.mxu1 %v1691_v2  ;;  %184 = vmatpush.msra.mxu2 %v1691_v2  ;;  %v1700_v5 = vld [vmem:[#allocation5 + $0x10] sm:$0xff]  ;;  %v65_v6 = vld [vmem:[%s2099_s1 + $0x20] sm:$0xff]  ;;  %v1707_v7 = vld [vmem:[#allocation5 + $0x8] sm:$0xff] }
   0xf   :  { %107 = vmatpush.msra.mxu0 %v67_v1  ;;  %v64_v8 = vld [vmem:[%s2099_s1 + $0x18] sm:$0xff]  ;;  %v1714_v9 = vld [vmem:[#allocation5] sm:$0xff]  ;;  %v63_v10 = vld [vmem:[%s2099_s1 + $0x10] sm:$0xff] }
  0x10   :  { %160 = vmatpush.msra.mxu1 %v1697_v4  ;;  %185 = vmatpush.msra.mxu2 %v1697_v4  ;;  %v62_v11 = vld [vmem:[%s2099_s1 + $0x8] sm:$0xff]  ;;  %v61_v13 = vld [vmem:[%s2099_s1] sm:$0xff]  ;;  %v348_v16 = vld [vmem:[#allocation2 + $0x18] sm:$0xff] }
  0x11   :  { %108 = vmatpush.msra.mxu0 %v66_v3  ;;  %v53_v14 = vld [vmem:[%s2098_s0] sm:$0xff]  ;;  %v347_v17 = vld [vmem:[#allocation2 + $0x10] sm:$0xff]  ;;  %v346_v18 = vld [vmem:[#allocation2 + $0x8] sm:$0xff] }
  0x12   :  { %161 = vmatpush.msra.mxu1 %v1700_v5  ;;  %186 = vmatpush.msra.mxu2 %v1700_v5  ;;  %v349_v15 = vld [vmem:[#allocation2 + $0x20] sm:$0xff]  ;;  %v54_v20 = vld [vmem:[%s2098_s0 + $0x8] sm:$0xff]  ;;  %v55_v21 = vld [vmem:[%s2098_s0 + $0x10] sm:$0xff] }
  0x13   :  { %109 = vmatpush.msra.mxu0 %v65_v6  ;;  %369 = vmatpush.msra.mxu3 %v349_v15  ;;  %v345_v19 = vld [vmem:[#allocation2] sm:$0xff]  ;;  %v56_v22 = vld [vmem:[%s2098_s0 + $0x18] sm:$0xff]  ;;  %v58_v29 = vld [vmem:[%s2098_s0 + $0x28] sm:$0xff] }
  0x14   :  { %162 = vmatpush.msra.mxu1 %v1707_v7  ;;  %187 = vmatpush.msra.mxu2 %v1707_v7  ;;  %v1768_v23 = vld [vmem:[%s2102_s4] ss:$0 sm:$0xff]  ;;  %v59_v31 = vld [vmem:[%s2098_s0 + $0x30] sm:$0xff]  ;;  %v60_v32 = vld [vmem:[%s2098_s0 + $0x38] sm:$0xff] }
  0x15   :  { %110 = vmatpush.msra.mxu0 %v64_v8  ;;  %370 = vmatpush.msra.mxu3 %v348_v16  ;;  %v57_v27 = vld [vmem:[%s2098_s0 + $0x20] sm:$0xff]  ;;  %v1816_v56 = vld [vmem:[#allocation5 + $0x48] sm:$0xff]  ;;  %v1822_v58 = vld [vmem:[#allocation5 + $0x38] sm:$0xff] }
  0x16   :  { %163 = vmatpush.msra.mxu1 %v1714_v9  ;;  %188 = vmatpush.msra.mxu2 %v1714_v9  ;;  %v1820_v57 = vld [vmem:[#allocation5 + $0x40] sm:$0xff]  ;;  %v1826_v59 = vld [vmem:[#allocation5 + $0x30] sm:$0xff]  ;;  %v1830_v60 = vld [vmem:[#allocation5 + $0x28] sm:$0xff] }
  0x17   :  { %111 = vmatpush.msra.mxu0 %v63_v10  ;;  %164 = vmatmul.f32.vlgmr.msra.gmra.mxu1 %v1647_v12  ;;  %v607_v1 = vld [vmem:[#allocation2 + $0x48] sm:$0xff]  ;;  %v605_v3 = vld [vmem:[#allocation2 + $0x38] sm:$0xff] }
  0x18   :  { %234 = vmatpush.msrb.mxu1 %v1691_v2  ;;  %259 = vmatpush.msrb.mxu2 %v1691_v2 }
  0x19   :  { %112 = vmatpush.msra.mxu0 %v62_v11  ;;  %371 = vmatpush.msra.mxu3 %v347_v17 }
  0x1a   :  { %235 = vmatpush.msrb.mxu1 %v1697_v4  ;;  %260 = vmatpush.msrb.mxu2 %v1697_v4 }
  0x1b   :  { %113 = vmatpush.msra.mxu0 %v61_v13  ;;  %372 = vmatpush.msra.mxu3 %v346_v18 }
  0x1c   :  { %1395 = vmatmul.msk.f32.vlgmr.msra.gmra.mxu0 %vm73_vm0, %v53_v14  ;;  %236 = vmatpush.msrb.mxu1 %v1700_v5 }
  0x1d   :  { %209 = vmatpush.msrb.mxu0 %v1691_v2  ;;  %261 = vmatpush.msrb.mxu2 %v1700_v5 }
  0x1e   :  { %237 = vmatpush.msrb.mxu1 %v1707_v7  ;;  %373 = vmatpush.msra.mxu3 %v345_v19 }
  0x1f   :  { %210 = vmatpush.msrb.mxu0 %v1697_v4  ;;  %262 = vmatpush.msrb.mxu2 %v1707_v7 }
  0x20   :  { %238 = vmatpush.msrb.mxu1 %v1714_v9 }
  0x21   :  { %211 = vmatpush.msrb.mxu0 %v1700_v5  ;;  %263 = vmatpush.msrb.mxu2 %v1714_v9 }
  0x22   :  { %284 = vmatpush.msra.mxu1 %v1691_v2 }
  0x23   :  { %212 = vmatpush.msrb.mxu0 %v1707_v7 }
  0x24   :  { %285 = vmatpush.msra.mxu1 %v1697_v4  ;;  %1396 = vmatmul.msk.f32.gmra.mxu0 %vm73_vm0, %v54_v20 }
  0x25   :  { %213 = vmatpush.msrb.mxu0 %v1714_v9 }
  0x26   :  { %286 = vmatpush.msra.mxu1 %v1700_v5 }
  0x27   :  { %627 = vmatpush.msra.mxu0 %v607_v1 }
  0x28   :  { %287 = vmatpush.msra.mxu1 %v1707_v7 }
  0x2a   :  { %288 = vmatpush.msra.mxu1 %v1714_v9 }
  0x2c   :  { %1397 = vmatmul.msk.f32.gmra.mxu0 %vm73_vm0, %v55_v21 }
  0x34   :  { %1398 = vmatmul.msk.f32.gmra.mxu0 %vm73_vm0, %v56_v22 }
  0x3c   :  { %1399 = vmatmul.msk.f32.gmra.mxu0 %vm73_vm0, %v57_v27 }
  0x44   :  { %1400 = vmatmul.msk.f32.gmra.mxu0 %vm73_vm0, %v58_v29 }
  0x4c   :  { %1401 = vmatmul.msk.f32.gmra.mxu0 %vm73_vm0, %v59_v31 }
  0x54   :  { %1402 = vmatmul.msk.f32.gmra.mxu0 %vm73_vm0, %v60_v32 }
  0x94   :  { %v165_v25 = vpop.f32.mrf.mxu1 }
  0x99   :  { %v115_v24 = vpop.f32.mrf.mxu0 }
  0x9a   :  { %v116_v26 = vadd.f32 %v1768_v23, %v115_v24 }
  0x9c   :  { %v168_v28 = vadd.f32 %v165_v25, %v116_v26 }
  0x9e   :  { %1485 = vtanh.f32 %v168_v28 }
  0xa1   :  { %v118_v33 = vpop.f32.mrf.mxu0 }
  0xa2   :  { %v119_v34 = vadd.f32 %v1768_v23, %v118_v33 }
  0xa4   :  { %v1486_v30 = vpop.eup %1485 }
  0xa5   :  { %1403 = vmatmul.msk.f32.vlgmr.msra.gmra.mxu2 %vm144_vm1, %v1486_v30  ;;  %1411 = vmatmul.msk.f32.vlgmr.msra.gmra.mxu3 %vm144_vm1, %v1486_v30 }
  0xa6   :  { %334 = vmatpush.msra.mxu2 %v1691_v2 }
  0xa8   :  { %335 = vmatpush.msra.mxu2 %v1697_v4 }
  0xa9   :  { %v121_v38 = vpop.f32.mrf.mxu0 }
  0xaa   :  { %336 = vmatpush.msra.mxu2 %v1700_v5  ;;  %v122_v44 = vadd.f32 %v1768_v23, %v121_v38 }
  0xac   :  { %337 = vmatpush.msra.mxu2 %v1707_v7 }
  0xae   :  { %338 = vmatpush.msra.mxu2 %v1714_v9 }
  0xb1   :  { %v124_v39 = vpop.f32.mrf.mxu0 }
  0xb2   :  { %v125_v48 = vadd.f32 %v1768_v23, %v124_v39 }
  0xb9   :  { %v127_v40 = vpop.f32.mrf.mxu0 }
  0xba   :  { %v128_v52 = vadd.f32 %v1768_v23, %v127_v40 }
  0xc1   :  { %v130_v41 = vpop.f32.mrf.mxu0 }
  0xc2   :  { %v131_v61 = vadd.f32 %v1768_v23, %v130_v41  ;;  %v1897_v41 = vld [vmem:[#allocation5 + $0x70] sm:$0xff] }
  0xc3   :  { %774 = vmatpush.msrb.mxu3 %v1897_v41 }
  0xc9   :  { %v1798_v42 = vpop.f32.mrf.mxu0 }
  0xca   :  { %v134_v6 = vadd.f32 %v1768_v23, %v1798_v42  ;;  %v661_v42 = vld [vmem:[#allocation5 + $0x68] sm:$0xff] }
  0xcb   :  { %775 = vmatpush.msrb.mxu3 %v661_v42 }
  0xd1   :  { %v1800_v43 = vpop.f32.mrf.mxu0 }
  0xd2   :  { %v137_v17 = vadd.f32 %v1768_v23, %v1800_v43  ;;  %v660_v43 = vld [vmem:[#allocation5 + $0x60] sm:$0xff] }
  0xd3   :  { %776 = vmatpush.msrb.mxu3 %v660_v43 }
 0x128   :  { %v190_v35 = vpop.f32.mrf.mxu2  ;;  %v375_v10 = vpop.f32.mrf.mxu3 }
 0x129   :  { %v193_v36 = vadd.f32 %v190_v35, %v119_v34 }
 0x12b   :  { %1487 = vtanh.f32 %v193_v36 }
 0x131   :  { %v1488_v37 = vpop.eup %1487 }
 0x132   :  { %1404 = vmatmul.msk.f32.vlgmr.msrb.gmra.mxu0 %vm144_vm1, %v1488_v37  ;;  %1412 = vmatmul.msk.f32.gmra.mxu3 %vm144_vm1, %v1488_v37 }
 0x1af   :  { %v215_v45 = vpop.f32.mrf.mxu0 }
 0x1b0   :  { %v218_v46 = vadd.f32 %v215_v45, %v122_v44  ;;  %v659_v44 = vld [vmem:[#allocation5 + $0x58] sm:$0xff]  ;;  %v658_v45 = vld [vmem:[#allocation5 + $0x50] sm:$0xff] }
 0x1b1   :  { %777 = vmatpush.msrb.mxu3 %v659_v44 }
 0x1b2   :  { %1489 = vtanh.f32 %v218_v46 }
 0x1b3   :  { %778 = vmatpush.msrb.mxu3 %v658_v45 }
 0x1b5   :  { %v378_v20 = vpop.f32.mrf.mxu3  ;;  %849 = vmatpush.msra.mxu3 %v1897_v41 }
 0x1b7   :  { %850 = vmatpush.msra.mxu3 %v661_v42 }
 0x1b8   :  { %v1490_v47 = vpop.eup %1489 }
 0x1b9   :  { %1405 = vmatmul.msk.f32.vlgmr.msrb.gmra.mxu1 %vm144_vm1, %v1490_v47  ;;  %1413 = vmatmul.msk.f32.gmra.mxu3 %vm144_vm1, %v1490_v47 }
 0x1ba   :  { %309 = vmatpush.msrb.mxu1 %v1691_v2  ;;  %v606_v2 = vld [vmem:[#allocation2 + $0x40] sm:$0xff]  ;;  %851 = vmatpush.msra.mxu3 %v660_v43 }
 0x1bb   :  { %628 = vmatpush.msra.mxu0 %v606_v2 }
 0x1bc   :  { %310 = vmatpush.msrb.mxu1 %v1697_v4  ;;  %v604_v4 = vld [vmem:[#allocation2 + $0x30] sm:$0xff]  ;;  %852 = vmatpush.msra.mxu3 %v659_v44 }
 0x1bd   :  { %629 = vmatpush.msra.mxu0 %v605_v3 }
 0x1be   :  { %311 = vmatpush.msrb.mxu1 %v1700_v5  ;;  %v603_v5 = vld [vmem:[#allocation2 + $0x28] sm:$0xff]  ;;  %853 = vmatpush.msra.mxu3 %v658_v45 }
 0x1bf   :  { %630 = vmatpush.msra.mxu0 %v604_v4 }
 0x1c0   :  { %312 = vmatpush.msrb.mxu1 %v1707_v7 }
 0x1c1   :  { %631 = vmatpush.msra.mxu0 %v603_v5 }
 0x1c2   :  { %313 = vmatpush.msrb.mxu1 %v1714_v9  ;;  %v1855_v9 = vld [vmem:[%s2102_s4 + $0x1] ss:$0 sm:$0xff] }
 0x1c3   :  { %v376_v11 = vadd.f32 %v1855_v9, %v375_v10  ;;  %v379_v21 = vadd.f32 %v1855_v9, %v378_v20  ;;  %v864_v20 = vld [vmem:[#allocation2 + $0x68] sm:$0xff] }
 0x236   :  { %v240_v49 = vpop.f32.mrf.mxu1 }
 0x237   :  { %v243_v50 = vadd.f32 %v240_v49, %v125_v48 }
 0x239   :  { %1491 = vtanh.f32 %v243_v50 }
 0x23c   :  { %v381_v23 = vpop.f32.mrf.mxu3 }
 0x23d   :  { %v382_v27 = vadd.f32 %v1855_v9, %v381_v23 }
 0x23f   :  { %v1492_v51 = vpop.eup %1491 }
 0x240   :  { %1406 = vmatmul.msk.f32.vlgmr.msrb.gmra.mxu2 %vm144_vm1, %v1492_v51  ;;  %1414 = vmatmul.msk.f32.gmra.mxu3 %vm144_vm1, %v1492_v51 }
 0x241   :  { %441 = vmatpush.msrb.mxu2 %v1816_v56 }
 0x243   :  { %442 = vmatpush.msrb.mxu2 %v1820_v57 }
 0x245   :  { %443 = vmatpush.msrb.mxu2 %v1822_v58 }
 0x247   :  { %444 = vmatpush.msrb.mxu2 %v1826_v59 }
 0x249   :  { %445 = vmatpush.msrb.mxu2 %v1830_v60 }
 0x2c3   :  { %v265_v53 = vpop.f32.mrf.mxu2  ;;  %v384_v31 = vpop.f32.mrf.mxu3 }
 0x2c4   :  { %v268_v54 = vadd.f32 %v265_v53, %v128_v52  ;;  %v385_v32 = vadd.f32 %v1855_v9, %v384_v31  ;;  %v1942_v31 = vld [vmem:[#allocation5 + $0x88] sm:$0xff] }
 0x2c6   :  { %1493 = vtanh.f32 %v268_v54 }
 0x2cc   :  { %v1494_v55 = vpop.eup %1493 }
 0x2cd   :  { %1407 = vmatmul.msk.f32.vlgmr.msra.gmra.mxu1 %vm144_vm1, %v1494_v55  ;;  %1415 = vmatmul.msk.f32.gmra.mxu3 %vm144_vm1, %v1494_v55  ;;  %v1913_v55 = vld [vmem:[%s2102_s4 + $0x2] ss:$0 sm:$0xff] }
 0x2ce   :  { %416 = vmatpush.msra.mxu1 %v1816_v56 }
 0x2d0   :  { %417 = vmatpush.msra.mxu1 %v1820_v57 }
 0x2d2   :  { %418 = vmatpush.msra.mxu1 %v1822_v58 }
 0x2d4   :  { %419 = vmatpush.msra.mxu1 %v1826_v59 }
 0x2d6   :  { %420 = vmatpush.msra.mxu1 %v1830_v60 }
 0x34a   :  { %v290_v62 = vpop.f32.mrf.mxu1 }
 0x34b   :  { %v293_v63 = vadd.f32 %v290_v62, %v131_v61 }
 0x34d   :  { %1495 = vtanh.f32 %v293_v63 }
 0x350   :  { %v387_v36 = vpop.f32.mrf.mxu3 }
 0x351   :  { %v388_v37 = vadd.f32 %v1855_v9, %v387_v36 }
 0x353   :  { %v1496_v0 = vpop.eup %1495 }
 0x354   :  { %1408 = vmatmul.msk.f32.vlgmr.msrb.gmra.mxu1 %vm144_vm1, %v1496_v0  ;;  %1416 = vmatmul.msk.f32.gmra.mxu3 %vm144_vm1, %v1496_v0 }
 0x355   :  { %466 = vmatpush.msrb.mxu1 %v1816_v56 }
 0x357   :  { %467 = vmatpush.msrb.mxu1 %v1820_v57 }
 0x359   :  { %468 = vmatpush.msrb.mxu1 %v1822_v58 }
 0x35b   :  { %469 = vmatpush.msrb.mxu1 %v1826_v59 }
 0x35c   :  { %421 = vmatmul.f32.vlgmr.msra.gmra.mxu1 %v1647_v12 }
 0x35d   :  { %470 = vmatpush.msrb.mxu1 %v1830_v60 }
 0x35f   :  { %516 = vmatpush.msra.mxu1 %v1816_v56 }
 0x361   :  { %517 = vmatpush.msra.mxu1 %v1820_v57 }
 0x363   :  { %518 = vmatpush.msra.mxu1 %v1822_v58 }
 0x365   :  { %519 = vmatpush.msra.mxu1 %v1826_v59 }
 0x367   :  { %520 = vmatpush.msra.mxu1 %v1830_v60 }
 0x3d1   :  { %v315_v7 = vpop.f32.mrf.mxu1 }
 0x3d2   :  { %v318_v8 = vadd.f32 %v315_v7, %v134_v6 }
 0x3d4   :  { %1497 = vtanh.f32 %v318_v8 }
 0x3d7   :  { %v390_v46 = vpop.f32.mrf.mxu3 }
 0x3d8   :  { %v391_v47 = vadd.f32 %v1855_v9, %v390_v46 }
 0x3d9   :  { %v422_v13 = vpop.f32.mrf.mxu1 }
 0x3da   :  { %v1498_v14 = vpop.eup %1497  ;;  %v425_v15 = vadd.f32 %v422_v13, %v376_v11 }
 0x3db   :  { %1409 = vmatmul.msk.f32.vlgmr.msra.gmra.mxu2 %vm144_vm1, %v1498_v14  ;;  %1417 = vmatmul.msk.f32.gmra.mxu3 %vm144_vm1, %v1498_v14 }
 0x3dc   :  { %1499 = vtanh.f32 %v425_v15  ;;  %491 = vmatpush.msra.mxu2 %v1816_v56 }
 0x3de   :  { %492 = vmatpush.msra.mxu2 %v1820_v57 }
 0x3e0   :  { %493 = vmatpush.msra.mxu2 %v1822_v58 }
 0x3e2   :  { %v1500_v16 = vpop.eup %1499  ;;  %494 = vmatpush.msra.mxu2 %v1826_v59 }
 0x3e3   :  { %1419 = vmatmul.msk.f32.vlgmr.msrb.gmra.mxu2 %vm144_vm1, %v1500_v16  ;;  %1427 = vmatmul.msk.f32.vlgmr.msra.gmra.mxu0 %vm144_vm1, %v1500_v16 }
 0x3e4   :  { %495 = vmatpush.msra.mxu2 %v1830_v60 }
 0x3e6   :  { %541 = vmatpush.msrb.mxu2 %v1816_v56 }
 0x3e8   :  { %542 = vmatpush.msrb.mxu2 %v1820_v57 }
 0x3ea   :  { %543 = vmatpush.msrb.mxu2 %v1822_v58 }
 0x3ec   :  { %544 = vmatpush.msrb.mxu2 %v1826_v59 }
 0x3ee   :  { %545 = vmatpush.msrb.mxu2 %v1830_v60 }
 0x45e   :  { %v340_v18 = vpop.f32.mrf.mxu2  ;;  %v393_v51 = vpop.f32.mrf.mxu3 }
 0x45f   :  { %v343_v19 = vadd.f32 %v340_v18, %v137_v17  ;;  %v394_v52 = vadd.f32 %v1855_v9, %v393_v51 }
 0x461   :  { %1501 = vtanh.f32 %v343_v19  ;;  %v865_v19 = vld [vmem:[#allocation2 + $0x70] sm:$0xff] }
 0x466   :  { %v447_v22 = vpop.f32.mrf.mxu2 }
 0x467   :  { %v1502_v24 = vpop.eup %1501  ;;  %v450_v25 = vadd.f32 %v447_v22, %v379_v21  ;;  %v863_v21 = vld [vmem:[#allocation2 + $0x60] sm:$0xff]  ;;  %v862_v22 = vld [vmem:[#allocation2 + $0x58] sm:$0xff] }
 0x468   :  { %1418 = vmatmul.msk.f32.gmra.mxu3 %vm144_vm1, %v1502_v24  ;;  %v861_v24 = vld [vmem:[#allocation2 + $0x50] sm:$0xff] }
 0x469   :  { %1503 = vtanh.f32 %v450_v25 }
 0x46f   :  { %v1504_v26 = vpop.eup %1503 }
 0x470   :  { %1420 = vmatmul.msk.f32.vlgmr.msrb.gmra.mxu1 %vm144_vm1, %v1504_v26  ;;  %1428 = vmatmul.msk.f32.gmra.mxu0 %vm144_vm1, %v1504_v26 }
 0x471   :  { %566 = vmatpush.msrb.mxu1 %v1816_v56 }
 0x473   :  { %567 = vmatpush.msrb.mxu1 %v1820_v57 }
 0x475   :  { %568 = vmatpush.msrb.mxu1 %v1822_v58 }
 0x477   :  { %569 = vmatpush.msrb.mxu1 %v1826_v59 }
 0x479   :  { %570 = vmatpush.msrb.mxu1 %v1830_v60 }
 0x4eb   :  { %v396_v62 = vpop.f32.mrf.mxu3 }
 0x4ec   :  { %v397_v63 = vadd.f32 %v1855_v9, %v396_v62 }
 0x4ed   :  { %v472_v28 = vpop.f32.mrf.mxu1 }
 0x4ee   :  { %v475_v29 = vadd.f32 %v472_v28, %v382_v27 }
 0x4f0   :  { %1505 = vtanh.f32 %v475_v29  ;;  %v1936_v29 = vld [vmem:[#allocation5 + $0x98] sm:$0xff] }
 0x4f1   :  { %1107 = vmatpush.msrb.mxu0 %v1936_v29 }
 0x4f6   :  { %v1506_v30 = vpop.eup %1505 }
 0x4f7   :  { %1421 = vmatmul.msk.f32.vlgmr.msra.gmra.mxu2 %vm144_vm1, %v1506_v30  ;;  %1429 = vmatmul.msk.f32.gmra.mxu0 %vm144_vm1, %v1506_v30  ;;  %v1940_v30 = vld [vmem:[#allocation5 + $0x90] sm:$0xff] }
 0x4f8   :  { %591 = vmatpush.msra.mxu2 %v1816_v56  ;;  %v633_v56 = vpop.f32.mrf.mxu0  ;;  %1108 = vmatpush.msrb.mxu0 %v1940_v30 }
 0x4fa   :  { %592 = vmatpush.msra.mxu2 %v1820_v57  ;;  %v634_v57 = vadd.f32 %v1913_v55, %v633_v56  ;;  %1109 = vmatpush.msrb.mxu0 %v1942_v31 }
 0x4fc   :  { %593 = vmatpush.msra.mxu2 %v1822_v58 }
 0x4fe   :  { %594 = vmatpush.msra.mxu2 %v1826_v59 }
 0x500   :  { %595 = vmatpush.msra.mxu2 %v1830_v60  ;;  %v636_v2 = vpop.f32.mrf.mxu0 }
 0x501   :  { %v637_v3 = vadd.f32 %v1913_v55, %v636_v2 }
 0x574   :  { %v639_v8 = vpop.f32.mrf.mxu0 }
 0x575   :  { %v640_v10 = vadd.f32 %v1913_v55, %v639_v8  ;;  %v1121_v8 = vld [vmem:[#allocation2 + $0x88] sm:$0xff] }
 0x57a   :  { %v497_v33 = vpop.f32.mrf.mxu2 }
 0x57b   :  { %v500_v34 = vadd.f32 %v497_v33, %v385_v32  ;;  %v1947_v32 = vld [vmem:[#allocation5 + $0x80] sm:$0xff]  ;;  %v1955_v33 = vld [vmem:[#allocation5 + $0x78] sm:$0xff] }
 0x57c   :  { %1110 = vmatpush.msrb.mxu0 %v1947_v32 }
 0x57d   :  { %1507 = vtanh.f32 %v500_v34 }
 0x57e   :  { %1111 = vmatpush.msrb.mxu0 %v1955_v33 }
 0x583   :  { %v1508_v35 = vpop.eup %1507 }
 0x584   :  { %1422 = vmatmul.msk.f32.vlgmr.msra.gmra.mxu1 %vm144_vm1, %v1508_v35  ;;  %1430 = vmatmul.msk.f32.gmra.mxu0 %vm144_vm1, %v1508_v35 }
 0x585   :  { %674 = vmatpush.msra.mxu1 %v1897_v41 }
 0x587   :  { %675 = vmatpush.msra.mxu1 %v661_v42 }
 0x589   :  { %676 = vmatpush.msra.mxu1 %v660_v43 }
 0x58b   :  { %677 = vmatpush.msra.mxu1 %v659_v44 }
 0x58d   :  { %678 = vmatpush.msra.mxu1 %v658_v45 }
 0x601   :  { %v522_v38 = vpop.f32.mrf.mxu1  ;;  %v642_v14 = vpop.f32.mrf.mxu0 }
 0x602   :  { %v525_v39 = vadd.f32 %v522_v38, %v388_v37  ;;  %v643_v15 = vadd.f32 %v1913_v55, %v642_v14 }
 0x604   :  { %1509 = vtanh.f32 %v525_v39 }
 0x60a   :  { %v1510_v40 = vpop.eup %1509 }
 0x60b   :  { %1423 = vmatmul.msk.f32.vlgmr.msrb.gmra.mxu2 %vm144_vm1, %v1510_v40  ;;  %1431 = vmatmul.msk.f32.gmra.mxu0 %vm144_vm1, %v1510_v40 }
 0x60c   :  { %699 = vmatpush.msrb.mxu2 %v1897_v41 }
 0x60e   :  { %700 = vmatpush.msrb.mxu2 %v661_v42 }
 0x610   :  { %701 = vmatpush.msrb.mxu2 %v660_v43 }
 0x612   :  { %702 = vmatpush.msrb.mxu2 %v659_v44 }
 0x614   :  { %703 = vmatpush.msrb.mxu2 %v658_v45 }
 0x688   :  { %v645_v25 = vpop.f32.mrf.mxu0 }
 0x689   :  { %v646_v26 = vadd.f32 %v1913_v55, %v645_v25 }
 0x68e   :  { %v547_v48 = vpop.f32.mrf.mxu2 }
 0x68f   :  { %v550_v49 = vadd.f32 %v547_v48, %v391_v47 }
 0x691   :  { %1511 = vtanh.f32 %v550_v49 }
 0x697   :  { %v1512_v50 = vpop.eup %1511 }
 0x698   :  { %1424 = vmatmul.msk.f32.vlgmr.msrb.gmra.mxu1 %vm144_vm1, %v1512_v50  ;;  %1432 = vmatmul.msk.f32.gmra.mxu0 %vm144_vm1, %v1512_v50 }
 0x699   :  { %724 = vmatpush.msrb.mxu1 %v1897_v41 }
 0x69b   :  { %725 = vmatpush.msrb.mxu1 %v661_v42 }
 0x69d   :  { %726 = vmatpush.msrb.mxu1 %v660_v43 }
 0x69f   :  { %727 = vmatpush.msrb.mxu1 %v659_v44 }
 0x6a0   :  { %679 = vmatmul.f32.vlgmr.msra.gmra.mxu1 %v1647_v12 }
 0x6a1   :  { %728 = vmatpush.msrb.mxu1 %v658_v45 }
 0x6a3   :  { %799 = vmatpush.msra.mxu1 %v1897_v41 }
 0x6a5   :  { %800 = vmatpush.msra.mxu1 %v661_v42 }
 0x6a7   :  { %801 = vmatpush.msra.mxu1 %v660_v43 }
 0x6a9   :  { %802 = vmatpush.msra.mxu1 %v659_v44 }
 0x6ab   :  { %803 = vmatpush.msra.mxu1 %v658_v45 }
 0x715   :  { %v572_v53 = vpop.f32.mrf.mxu1  ;;  %v648_v34 = vpop.f32.mrf.mxu0 }
 0x716   :  { %v575_v54 = vadd.f32 %v572_v53, %v394_v52  ;;  %v649_v35 = vadd.f32 %v1913_v55, %v648_v34 }
 0x718   :  { %1513 = vtanh.f32 %v575_v54 }
 0x71d   :  { %v680_v58 = vpop.f32.mrf.mxu1 }
 0x71e   :  { %v1514_v59 = vpop.eup %1513  ;;  %v683_v60 = vadd.f32 %v680_v58, %v634_v57 }
 0x71f   :  { %1425 = vmatmul.msk.f32.vlgmr.msra.gmra.mxu2 %vm144_vm1, %v1514_v59  ;;  %1433 = vmatmul.msk.f32.gmra.mxu0 %vm144_vm1, %v1514_v59 }
 0x720   :  { %1515 = vtanh.f32 %v683_v60  ;;  %749 = vmatpush.msra.mxu2 %v1897_v41 }
 0x722   :  { %750 = vmatpush.msra.mxu2 %v661_v42 }
 0x724   :  { %751 = vmatpush.msra.mxu2 %v660_v43 }
 0x726   :  { %v1516_v61 = vpop.eup %1515  ;;  %752 = vmatpush.msra.mxu2 %v659_v44 }
 0x727   :  { %1435 = vmatmul.msk.f32.vlgmr.msrb.gmra.mxu2 %vm144_vm1, %v1516_v61 }
 0x728   :  { %753 = vmatpush.msra.mxu2 %v658_v45 }
 0x72a   :  { %824 = vmatpush.msrb.mxu2 %v1897_v41 }
 0x72c   :  { %825 = vmatpush.msrb.mxu2 %v661_v42 }
 0x72e   :  { %826 = vmatpush.msrb.mxu2 %v660_v43  ;;  %v1979_v43 = vld [vmem:[%s2102_s4 + $0x3] ss:$0 sm:$0xff] }
 0x730   :  { %827 = vmatpush.msrb.mxu2 %v659_v44 }
 0x732   :  { %828 = vmatpush.msrb.mxu2 %v658_v45 }
 0x79c   :  { %v651_v39 = vpop.f32.mrf.mxu0 }
 0x79d   :  { %v652_v40 = vadd.f32 %v1913_v55, %v651_v39 }
 0x7a2   :  { %v597_v0 = vpop.f32.mrf.mxu2 }
 0x7a3   :  { %v600_v1 = vadd.f32 %v597_v0, %v397_v63 }
 0x7a5   :  { %1517 = vtanh.f32 %v600_v1 }
 0x7aa   :  { %v705_v4 = vpop.f32.mrf.mxu2 }
 0x7ab   :  { %v1518_v5 = vpop.eup %1517  ;;  %v708_v6 = vadd.f32 %v705_v4, %v637_v3 }
 0x7ac   :  { %1434 = vmatmul.msk.f32.gmra.mxu0 %vm144_vm1, %v1518_v5 }
 0x7ad   :  { %1519 = vtanh.f32 %v708_v6  ;;  %v1123_v6 = vld [vmem:[#allocation2 + $0x98] sm:$0xff] }
 0x7b3   :  { %v1520_v7 = vpop.eup %1519 }
 0x7b4   :  { %1436 = vmatmul.msk.f32.vlgmr.msrb.gmra.mxu1 %vm144_vm1, %v1520_v7 }
 0x7b5   :  { %885 = vmatpush.msrb.mxu1 %v865_v19  ;;  %v2021_v19 = vld [vmem:[#allocation5 + $0xb0] sm:$0xff] }
 0x7b7   :  { %886 = vmatpush.msrb.mxu1 %v864_v20  ;;  %v2026_v20 = vld [vmem:[#allocation5 + $0xa8] sm:$0xff] }
 0x7b9   :  { %887 = vmatpush.msrb.mxu1 %v863_v21  ;;  %v2034_v21 = vld [vmem:[#allocation5 + $0xa0] sm:$0xff] }
 0x7bb   :  { %888 = vmatpush.msrb.mxu1 %v862_v22 }
 0x7bd   :  { %889 = vmatpush.msrb.mxu1 %v861_v24 }
 0x829   :  { %v654_v50 = vpop.f32.mrf.mxu0 }
 0x82a   :  { %v655_v51 = vadd.f32 %v1913_v55, %v654_v50 }
 0x831   :  { %v730_v11 = vpop.f32.mrf.mxu1 }
 0x832   :  { %v733_v9 = vadd.f32 %v730_v11, %v640_v10  ;;  %v1120_v10 = vld [vmem:[#allocation2 + $0x80] sm:$0xff]  ;;  %v1119_v11 = vld [vmem:[#allocation2 + $0x78] sm:$0xff] }
 0x834   :  { %1521 = vtanh.f32 %v733_v9 }
 0x83a   :  { %v1522_v13 = vpop.eup %1521 }
 0x83b   :  { %1437 = vmatmul.msk.f32.vlgmr.msra.gmra.mxu2 %vm144_vm1, %v1522_v13 }
 0x83c   :  { %932 = vmatpush.msra.mxu2 %v1936_v29 }
 0x83e   :  { %933 = vmatpush.msra.mxu2 %v1940_v30 }
 0x840   :  { %934 = vmatpush.msra.mxu2 %v1942_v31 }
 0x842   :  { %935 = vmatpush.msra.mxu2 %v1947_v32 }
 0x844   :  { %936 = vmatpush.msra.mxu2 %v1955_v33 }
 0x8be   :  { %v755_v16 = vpop.f32.mrf.mxu2 }
 0x8bf   :  { %v758_v17 = vadd.f32 %v755_v16, %v643_v15 }
 0x8c1   :  { %1523 = vtanh.f32 %v758_v17  ;;  %v2015_v17 = vld [vmem:[#allocation5 + $0xc0] sm:$0xff] }
 0x8c2   :  { %1215 = vmatpush.msra.mxu0 %v2015_v17 }
 0x8c7   :  { %v1524_v18 = vpop.eup %1523 }
 0x8c8   :  { %1438 = vmatmul.msk.f32.vlgmr.msrb.gmra.mxu3 %vm144_vm1, %v1524_v18 }
 0x8c9   :  { %957 = vmatpush.msrb.mxu3 %v1936_v29 }
 0x8cb   :  { %958 = vmatpush.msrb.mxu3 %v1940_v30 }
 0x8cd   :  { %959 = vmatpush.msrb.mxu3 %v1942_v31 }
 0x8cf   :  { %960 = vmatpush.msrb.mxu3 %v1947_v32 }
 0x8d1   :  { %961 = vmatpush.msrb.mxu3 %v1955_v33 }
 0x94b   :  { %v780_v23 = vpop.f32.mrf.mxu3 }
 0x94c   :  { %v783_v27 = vadd.f32 %v780_v23, %v646_v26 }
 0x94e   :  { %1525 = vtanh.f32 %v783_v27 }
 0x954   :  { %v1526_v28 = vpop.eup %1525 }
 0x955   :  { %1439 = vmatmul.msk.f32.vlgmr.msra.gmra.mxu1 %vm144_vm1, %v1526_v28 }
 0x956   :  { %1340 = vmatpush.msra.mxu1 %v2015_v17 }
 0x95d   :  { %1443 = vmatmul.msk.f32.vlgmr.msrb.gmra.mxu1 %vm144_vm1, %v1516_v61 }
 0x965   :  { %1444 = vmatmul.msk.f32.gmra.mxu1 %vm144_vm1, %v1520_v7  ;;  %v1122_v7 = vld [vmem:[#allocation2 + $0x90] sm:$0xff] }
 0x96d   :  { %1445 = vmatmul.msk.f32.gmra.mxu1 %vm144_vm1, %v1522_v13 }
 0x975   :  { %1446 = vmatmul.msk.f32.gmra.mxu1 %vm144_vm1, %v1524_v18  ;;  %v2019_v18 = vld [vmem:[#allocation5 + $0xb8] sm:$0xff] }
 0x976   :  { %1216 = vmatpush.msra.mxu0 %v2019_v18  ;;  %1341 = vmatpush.msra.mxu1 %v2019_v18 }
 0x978   :  { %1217 = vmatpush.msra.mxu0 %v2021_v19  ;;  %1342 = vmatpush.msra.mxu1 %v2021_v19 }
 0x97a   :  { %1218 = vmatpush.msra.mxu0 %v2026_v20  ;;  %1343 = vmatpush.msra.mxu1 %v2026_v20 }
 0x97c   :  { %1219 = vmatpush.msra.mxu0 %v2034_v21  ;;  %1344 = vmatpush.msra.mxu1 %v2034_v21 }
 0x97d   :  { %1447 = vmatmul.msk.f32.gmra.mxu1 %vm144_vm1, %v1526_v28 }
 0x9d2   :  { %v805_v36 = vpop.f32.mrf.mxu1 }
 0x9d3   :  { %v808_v37 = vadd.f32 %v805_v36, %v649_v35 }
 0x9d5   :  { %1527 = vtanh.f32 %v808_v37 }
 0x9da   :  { %v891_v44 = vpop.f32.mrf.mxu1 }
 0x9db   :  { %v1528_v38 = vpop.eup %1527  ;;  %v892_v45 = vadd.f32 %v1979_v43, %v891_v44 }
 0x9dc   :  { %1440 = vmatmul.msk.f32.vlgmr.msrb.gmra.mxu2 %vm144_vm1, %v1528_v38  ;;  %1448 = vmatmul.msk.f32.gmra.mxu1 %vm144_vm1, %v1528_v38 }
 0x9dd   :  { %982 = vmatpush.msrb.mxu2 %v1936_v29 }
 0x9df   :  { %983 = vmatpush.msrb.mxu2 %v1940_v30 }
 0x9e1   :  { %984 = vmatpush.msrb.mxu2 %v1942_v31 }
 0x9e2   :  { %v894_v54 = vpop.f32.mrf.mxu1 }
 0x9e3   :  { %985 = vmatpush.msrb.mxu2 %v1947_v32  ;;  %v895_v56 = vadd.f32 %v1979_v43, %v894_v54 }
 0x9e4   :  { %937 = vmatmul.f32.vlgmr.msra.gmra.mxu2 %v1647_v12 }
 0x9e5   :  { %986 = vmatpush.msrb.mxu2 %v1955_v33 }
 0x9e7   :  { %1032 = vmatpush.msra.mxu2 %v1936_v29 }
 0x9e9   :  { %1033 = vmatpush.msra.mxu2 %v1940_v30 }
 0x9ea   :  { %v897_v55 = vpop.f32.mrf.mxu1 }
 0x9eb   :  { %1034 = vmatpush.msra.mxu2 %v1942_v31  ;;  %v898_v61 = vadd.f32 %v1979_v43, %v897_v55 }
 0x9ed   :  { %1035 = vmatpush.msra.mxu2 %v1947_v32 }
 0x9ef   :  { %1036 = vmatpush.msra.mxu2 %v1955_v33 }
 0x9f2   :  { %v900_v1 = vpop.f32.mrf.mxu1 }
 0x9f3   :  { %v901_v2 = vadd.f32 %v1979_v43, %v900_v1 }
 0x9fa   :  { %v903_v9 = vpop.f32.mrf.mxu1 }
 0x9fb   :  { %v904_v13 = vadd.f32 %v1979_v43, %v903_v9 }
 0xa59   :  { %v906_v22 = vpop.f32.mrf.mxu1 }
 0xa5a   :  { %v907_v24 = vadd.f32 %v1979_v43, %v906_v22 }
 0xa5f   :  { %v830_v41 = vpop.f32.mrf.mxu2 }
 0xa60   :  { %v833_v42 = vadd.f32 %v830_v41, %v652_v40 }
 0xa62   :  { %1529 = vtanh.f32 %v833_v42 }
 0xa67   :  { %v938_v46 = vpop.f32.mrf.mxu2 }
 0xa68   :  { %v1530_v47 = vpop.eup %1529  ;;  %v941_v48 = vadd.f32 %v938_v46, %v892_v45 }
 0xa69   :  { %1441 = vmatmul.msk.f32.vlgmr.msra.gmra.mxu3 %vm144_vm1, %v1530_v47  ;;  %1449 = vmatmul.msk.f32.gmra.mxu1 %vm144_vm1, %v1530_v47 }
 0xa6a   :  { %1531 = vtanh.f32 %v941_v48  ;;  %1007 = vmatpush.msra.mxu3 %v1936_v29 }
 0xa6c   :  { %1008 = vmatpush.msra.mxu3 %v1940_v30 }
 0xa6e   :  { %1009 = vmatpush.msra.mxu3 %v1942_v31 }
 0xa70   :  { %v1532_v49 = vpop.eup %1531  ;;  %1010 = vmatpush.msra.mxu3 %v1947_v32 }
 0xa71   :  { %1451 = vmatmul.msk.f32.vlgmr.msrb.gmra.mxu3 %vm144_vm1, %v1532_v49 }
 0xa72   :  { %1011 = vmatpush.msra.mxu3 %v1955_v33 }
 0xa74   :  { %1057 = vmatpush.msrb.mxu3 %v1936_v29 }
 0xa76   :  { %1058 = vmatpush.msrb.mxu3 %v1940_v30 }
 0xa78   :  { %1059 = vmatpush.msrb.mxu3 %v1942_v31 }
 0xa7a   :  { %1060 = vmatpush.msrb.mxu3 %v1947_v32 }
 0xa7c   :  { %1061 = vmatpush.msrb.mxu3 %v1955_v33 }
 0xae6   :  { %v909_v27 = vpop.f32.mrf.mxu1 }
 0xae7   :  { %v910_v28 = vadd.f32 %v1979_v43, %v909_v27 }
 0xaec   :  { %v855_v52 = vpop.f32.mrf.mxu3 }
 0xaed   :  { %v858_v53 = vadd.f32 %v855_v52, %v655_v51 }
 0xaef   :  { %1533 = vtanh.f32 %v858_v53 }
 0xaf4   :  { %v963_v57 = vpop.f32.mrf.mxu3 }
 0xaf5   :  { %v1534_v58 = vpop.eup %1533  ;;  %v966_v59 = vadd.f32 %v963_v57, %v895_v56 }
 0xaf6   :  { %1450 = vmatmul.msk.f32.gmra.mxu1 %vm144_vm1, %v1534_v58 }
 0xaf7   :  { %1535 = vtanh.f32 %v966_v59 }
 0xafd   :  { %v1536_v60 = vpop.eup %1535 }
 0xafe   :  { %1452 = vmatmul.msk.f32.vlgmr.msrb.gmra.mxu2 %vm144_vm1, %v1536_v60 }
 0xaff   :  { %1082 = vmatpush.msrb.mxu2 %v1936_v29 }
 0xb01   :  { %1083 = vmatpush.msrb.mxu2 %v1940_v30 }
 0xb03   :  { %1084 = vmatpush.msrb.mxu2 %v1942_v31 }
 0xb05   :  { %1085 = vmatpush.msrb.mxu2 %v1947_v32 }
 0xb07   :  { %1086 = vmatpush.msrb.mxu2 %v1955_v33 }
 0xb73   :  { %v912_v37 = vpop.f32.mrf.mxu1 }
 0xb74   :  { %v913_v38 = vadd.f32 %v1979_v43, %v912_v37 }
 0xb81   :  { %v988_v62 = vpop.f32.mrf.mxu2 }
 0xb82   :  { %v991_v63 = vadd.f32 %v988_v62, %v898_v61 }
 0xb84   :  { %1537 = vtanh.f32 %v991_v63 }
 0xb8a   :  { %v1538_v0 = vpop.eup %1537 }
 0xb8b   :  { %1453 = vmatmul.msk.f32.vlgmr.msra.gmra.mxu3 %vm144_vm1, %v1538_v0 }
 0xb8c   :  { %1143 = vmatpush.msra.mxu3 %v1123_v6 }
 0xb8e   :  { %1144 = vmatpush.msra.mxu3 %v1122_v7 }
 0xb90   :  { %1145 = vmatpush.msra.mxu3 %v1121_v8 }
 0xb92   :  { %1146 = vmatpush.msra.mxu3 %v1120_v10 }
 0xb94   :  { %1147 = vmatpush.msra.mxu3 %v1119_v11 }
 0xc0e   :  { %v1013_v3 = vpop.f32.mrf.mxu3 }
 0xc0f   :  { %v1016_v4 = vadd.f32 %v1013_v3, %v901_v2 }
 0xc11   :  { %1539 = vtanh.f32 %v1016_v4 }
 0xc17   :  { %v1540_v5 = vpop.eup %1539 }
 0xc18   :  { %1454 = vmatmul.msk.f32.vlgmr.msra.gmra.mxu2 %vm144_vm1, %v1540_v5 }
 0xc19   :  { %1190 = vmatpush.msra.mxu2 %v2015_v17 }
 0xc1b   :  { %1191 = vmatpush.msra.mxu2 %v2019_v18 }
 0xc1d   :  { %1192 = vmatpush.msra.mxu2 %v2021_v19 }
 0xc1f   :  { %1193 = vmatpush.msra.mxu2 %v2026_v20 }
 0xc21   :  { %1194 = vmatpush.msra.mxu2 %v2034_v21 }
 0xc9b   :  { %v1038_v14 = vpop.f32.mrf.mxu2 }
 0xc9c   :  { %v1041_v15 = vadd.f32 %v1038_v14, %v904_v13 }
 0xc9e   :  { %1541 = vtanh.f32 %v1041_v15 }
 0xca4   :  { %v1542_v16 = vpop.eup %1541 }
 0xca5   :  { %1455 = vmatmul.msk.f32.vlgmr.msrb.gmra.mxu3 %vm144_vm1, %v1542_v16 }
 0xcad   :  { %1459 = vmatmul.msk.f32.vlgmr.msra.gmra.mxu3 %vm144_vm1, %v1532_v49 }
 0xcb5   :  { %1460 = vmatmul.msk.f32.gmra.mxu3 %vm144_vm1, %v1536_v60 }
 0xcbd   :  { %1461 = vmatmul.msk.f32.gmra.mxu3 %vm144_vm1, %v1538_v0 }
 0xcc5   :  { %1462 = vmatmul.msk.f32.gmra.mxu3 %vm144_vm1, %v1540_v5 }
 0xccd   :  { %1463 = vmatmul.msk.f32.gmra.mxu3 %vm144_vm1, %v1542_v16 }
 0xd28   :  { %v1063_v25 = vpop.f32.mrf.mxu3 }
 0xd29   :  { %v1066_v26 = vadd.f32 %v1063_v25, %v907_v24 }
 0xd2b   :  { %1543 = vtanh.f32 %v1066_v26 }
 0xd30   :  { %v1149_v31 = vpop.f32.mrf.mxu3 }
 0xd31   :  { %v1544_v23 = vpop.eup %1543 }
 0xd32   :  { %1456 = vmatmul.msk.f32.vlgmr.msrb.gmra.mxu2 %vm144_vm1, %v1544_v23  ;;  %1464 = vmatmul.msk.f32.gmra.mxu3 %vm144_vm1, %v1544_v23 }
 0xd33   :  { %1240 = vmatpush.msrb.mxu2 %v2015_v17 }
 0xd35   :  { %1241 = vmatpush.msrb.mxu2 %v2019_v18 }
 0xd37   :  { %1242 = vmatpush.msrb.mxu2 %v2021_v19 }
 0xd38   :  { %v1152_v41 = vpop.f32.mrf.mxu3 }
 0xd39   :  { %1243 = vmatpush.msrb.mxu2 %v2026_v20 }
 0xd3a   :  { %1195 = vmatmul.f32.vlgmr.msra.gmra.mxu2 %v1647_v12  ;;  %v2058_v12 = vld [vmem:[%s2102_s4 + $0x4] ss:$0 sm:$0xff]  ;;  %s1648_s4 = smov [#allocation7]  }
 0xd3b   :  { %1244 = vmatpush.msrb.mxu2 %v2034_v21  ;;  %v1150_v32 = vadd.f32 %v2058_v12, %v1149_v31  ;;  %v1153_v42 = vadd.f32 %v2058_v12, %v1152_v41  ;;  %s1382_s16 = sshll.u32 %s1648_s4, 4  ;;  %s1383_s16 = int_to_ptr.vmem [resolvable:$true] %s1382_s16 }
 0xd3d   :  { %1290 = vmatpush.msra.mxu2 %v2015_v17 }
 0xd3f   :  { %1291 = vmatpush.msra.mxu2 %v2019_v18 }
 0xd40   :  { %v1155_v43 = vpop.f32.mrf.mxu3 }
 0xd41   :  { %1292 = vmatpush.msra.mxu2 %v2021_v19  ;;  %v1156_v48 = vadd.f32 %v2058_v12, %v1155_v43 }
 0xd43   :  { %1293 = vmatpush.msra.mxu2 %v2026_v20 }
 0xd45   :  { %1294 = vmatpush.msra.mxu2 %v2034_v21 }
 0xd48   :  { %v1158_v52 = vpop.f32.mrf.mxu3 }
 0xd49   :  { %v1159_v53 = vadd.f32 %v2058_v12, %v1158_v52 }
 0xd50   :  { %v1161_v58 = vpop.f32.mrf.mxu3 }
 0xd51   :  { %v1162_v59 = vadd.f32 %v2058_v12, %v1161_v58 }
 0xdb5   :  { %v1088_v29 = vpop.f32.mrf.mxu2  ;;  %v1164_v62 = vpop.f32.mrf.mxu3 }
 0xdb6   :  { %v1091_v30 = vadd.f32 %v1088_v29, %v910_v28  ;;  %v1165_v63 = vadd.f32 %v2058_v12, %v1164_v62 }
 0xdb8   :  { %1545 = vtanh.f32 %v1091_v30 }
 0xdbd   :  { %v1196_v33 = vpop.f32.mrf.mxu2 }
 0xdbe   :  { %v1546_v34 = vpop.eup %1545  ;;  %v1199_v35 = vadd.f32 %v1196_v33, %v1150_v32 }
 0xdbf   :  { %1457 = vmatmul.msk.f32.vlgmr.msrb.gmra.mxu0 %vm144_vm1, %v1546_v34  ;;  %1465 = vmatmul.msk.f32.gmra.mxu3 %vm144_vm1, %v1546_v34 }
 0xdc0   :  { %1547 = vtanh.f32 %v1199_v35  ;;  %1265 = vmatpush.msrb.mxu0 %v2015_v17 }
 0xdc2   :  { %1266 = vmatpush.msrb.mxu0 %v2019_v18 }
 0xdc4   :  { %1267 = vmatpush.msrb.mxu0 %v2021_v19 }
 0xdc6   :  { %v1548_v36 = vpop.eup %1547  ;;  %1268 = vmatpush.msrb.mxu0 %v2026_v20 }
 0xdc7   :  { %1467 = vmatmul.msk.f32.vlgmr.msra.gmra.mxu0 %vm144_vm1, %v1548_v36 }
 0xdc8   :  { %1269 = vmatpush.msrb.mxu0 %v2034_v21 }
 0xdca   :  { %1315 = vmatpush.msra.mxu0 %v2015_v17 }
 0xdcc   :  { %1316 = vmatpush.msra.mxu0 %v2019_v18 }
 0xdce   :  { %1317 = vmatpush.msra.mxu0 %v2021_v19 }
 0xdd0   :  { %1318 = vmatpush.msra.mxu0 %v2026_v20 }
 0xdd2   :  { %1319 = vmatpush.msra.mxu0 %v2034_v21 }
 0xe3c   :  { %v1113_v39 = vpop.f32.mrf.mxu0 }
 0xe3d   :  { %v1116_v40 = vadd.f32 %v1113_v39, %v913_v38 }
 0xe3f   :  { %1549 = vtanh.f32 %v1116_v40 }
 0xe42   :  { %v1167_v3 = vpop.f32.mrf.mxu3 }
 0xe43   :  { %v1168_v4 = vadd.f32 %v2058_v12, %v1167_v3 }
 0xe44   :  { %v1221_v44 = vpop.f32.mrf.mxu0 }
 0xe45   :  { %v1550_v45 = vpop.eup %1549  ;;  %v1224_v46 = vadd.f32 %v1221_v44, %v1153_v42 }
 0xe46   :  { %1466 = vmatmul.msk.f32.gmra.mxu3 %vm144_vm1, %v1550_v45 }
 0xe47   :  { %1551 = vtanh.f32 %v1224_v46 }
 0xe4d   :  { %v1552_v47 = vpop.eup %1551 }
 0xe4e   :  { %1468 = vmatmul.msk.f32.vlgmr.msrb.gmra.mxu2 %vm144_vm1, %v1552_v47 }
 0xe4f   :  { %1365 = vmatpush.msrb.mxu2 %v2015_v17 }
 0xe51   :  { %1366 = vmatpush.msrb.mxu2 %v2019_v18 }
 0xe53   :  { %1367 = vmatpush.msrb.mxu2 %v2021_v19 }
 0xe55   :  { %1368 = vmatpush.msrb.mxu2 %v2026_v20 }
 0xe57   :  { %1369 = vmatpush.msrb.mxu2 %v2034_v21 }
 0xec9   :  { %v1170_v8 = vpop.f32.mrf.mxu3 }
 0xeca   :  { %v1171_v10 = vadd.f32 %v2058_v12, %v1170_v8 }
 0xed1   :  { %v1246_v49 = vpop.f32.mrf.mxu2 }
 0xed2   :  { %v1249_v50 = vadd.f32 %v1246_v49, %v1156_v48 }
 0xed4   :  { %1553 = vtanh.f32 %v1249_v50 }
 0xeda   :  { %v1554_v51 = vpop.eup %1553 }
 0xedb   :  { %1469 = vmatmul.msk.f32.vlgmr.msrb.gmra.mxu0 %vm144_vm1, %v1554_v51 }
 0xf58   :  { %v1271_v54 = vpop.f32.mrf.mxu0 }
 0xf59   :  { %v1274_v56 = vadd.f32 %v1271_v54, %v1159_v53 }
 0xf5b   :  { %1555 = vtanh.f32 %v1274_v56 }
 0xf61   :  { %v1556_v57 = vpop.eup %1555 }
 0xf62   :  { %1470 = vmatmul.msk.f32.vlgmr.msra.gmra.mxu2 %vm144_vm1, %v1556_v57 }
 0xfe5   :  { %v1296_v60 = vpop.f32.mrf.mxu2 }
 0xfe6   :  { %v1299_v55 = vadd.f32 %v1296_v60, %v1162_v59 }
 0xfe8   :  { %1557 = vtanh.f32 %v1299_v55 }
 0xfee   :  { %v1558_v61 = vpop.eup %1557 }
 0xfef   :  { %1471 = vmatmul.msk.f32.vlgmr.msra.gmra.mxu0 %vm144_vm1, %v1558_v61 }
0x106c   :  { %v1321_v0 = vpop.f32.mrf.mxu0 }
0x106d   :  { %v1324_v1 = vadd.f32 %v1321_v0, %v1165_v63 }
0x106f   :  { %1559 = vtanh.f32 %v1324_v1 }
0x1075   :  { %v1560_v2 = vpop.eup %1559 }
0x1076   :  { %1472 = vmatmul.msk.f32.vlgmr.msra.gmra.mxu1 %vm144_vm1, %v1560_v2 }
0x10f3   :  { %v1346_v5 = vpop.f32.mrf.mxu1 }
0x10f4   :  { %v1349_v6 = vadd.f32 %v1346_v5, %v1168_v4 }
0x10f6   :  { %1561 = vtanh.f32 %v1349_v6 }
0x10fc   :  { %v1562_v7 = vpop.eup %1561 }
0x10fd   :  { %1473 = vmatmul.msk.f32.vlgmr.msrb.gmra.mxu2 %vm144_vm1, %v1562_v7 }
0x1180   :  { %v1371_v11 = vpop.f32.mrf.mxu2 }
0x1181   :  { %v1374_v9 = vadd.f32 %v1371_v11, %v1171_v10 }
0x1183   :  { %1563 = vtanh.f32 %v1374_v9 }
0x1189   :  { %v1564_v13 = vpop.eup %1563 }
0x118a   :  { %1376 = vst.msk [vmem:[#allocation7] sm:$0xff] %vm144_vm1, %v1564_v13 }
0x118b   :  { %1387 = dma.vmem_to_hbm [thread:$0]  %s1383_s16, 128, %s1385_s19, [#allocation4]  }
0x118c   :  { %1641 = dma.done.wait [#allocation4], 128  }
0x118d   :  { %1642 = vsyncadd [#allocation4], 4294967168 }
0x118e   :  { %1392 = vsyncpa [#allocation3], 1 }
0x118f   :  { %1393 = vsyncpa [#allocation6], 1 }
0x1190   :  { %1394 = vsyncpa [#allocation4], 1 }

</bundles_post_ra>
